<compile_context>
chip_gen: v6e
topology: v6e:2x2x1
jax: 0.10.0
libtpu: 0.0.40
codegen_flags: <defaults>
</compile_context>

<pallas_src>
import jax
import jax.numpy as jnp
from jax.experimental import pallas as pl
from jax.experimental.pallas import tpu as pltpu

# ---- small synthetic config (stands in for the HF decoder config) ----
B, S, H = 2, 8, 32          # batch, sequence, hidden
N_HEADS = 2
D_HEAD = H // N_HEADS
N_LAYERS = 2
D_FF = 64
VOCAB = 256
EPS = 1e-5
KV_PACK = N_LAYERS * 2 * H  # 128 -> lane-dense packed K/V output


# -------------------- fused forward kernel --------------------

def _fused_forward_kernel(
    ids_ref, pad_ref, wte_ref, wpe_ref,
    ln1_g_ref, ln1_b_ref, w_qkv_ref, b_qkv_ref, w_o_ref, b_o_ref,
    ln2_g_ref, ln2_b_ref, w_ff1_ref, b_ff1_ref, w_ff2_ref, b_ff2_ref,
    lnf_g_ref, lnf_b_ref, w_lm_ref,
    logits_ref, kv_ref,
):
    f32, bf16 = jnp.float32, jnp.bfloat16

    def layer_norm(v, g, b):
        mean = jnp.mean(v, axis=-1, keepdims=True)
        c = v - mean
        var = jnp.mean(c * c, axis=-1, keepdims=True)
        return c * jax.lax.rsqrt(var + EPS) * g + b

    # ---- embedding gather as a one-hot matmul on the MXU (exact row selection, f32 table) ----
    ids = ids_ref[0]                                                       # (S, 1) int32
    onehot = (ids == jax.lax.broadcasted_iota(jnp.int32, (S, VOCAB), 1)).astype(f32)
    x = jnp.dot(onehot, wte_ref[...], preferred_element_type=f32) + wpe_ref[...]   # (S, H) f32

    # ---- causal + padding mask, built in-registers (no (S,S) bias DMA) ----
    row = jax.lax.broadcasted_iota(jnp.int32, (S, S), 0)
    col = jax.lax.broadcasted_iota(jnp.int32, (S, S), 1)
    keep = jnp.logical_and(col <= row, pad_ref[0] > 0.5)                   # (S, S) bool

    scale = 1.0 / (D_HEAD ** 0.5)

    for l in range(N_LAYERS):        # unrolled; all layer weights stay resident in VMEM
        # --- self-attention block: LN1 -> QKV -> attention -> out proj -> residual ---
        h = layer_norm(x, ln1_g_ref[l], ln1_b_ref[l])                      # (S, H) f32
        qkv = jnp.dot(h.astype(bf16), w_qkv_ref[l],
                      preferred_element_type=f32) + b_qkv_ref[l]           # (S, 3H) f32
        q = qkv[:, 0 * H:1 * H]
        k = qkv[:, 1 * H:2 * H]
        v = qkv[:, 2 * H:3 * H]

        # present K/V: K and V are adjacent in the QKV output -> one contiguous 2H-wide store
        kv_ref[0, :, (2 * l) * H:(2 * l + 2) * H] = qkv[:, H:3 * H]

        attn_proj = None
        for hd in range(N_HEADS):
            lo, hi = hd * D_HEAD, (hd + 1) * D_HEAD
            q_h = (q[:, lo:hi] * scale).astype(bf16)
            k_h = k[:, lo:hi].astype(bf16)
            v_h = v[:, lo:hi].astype(bf16)
            # q @ k^T without materializing a transpose: contract last axes directly
            s = jax.lax.dot_general(q_h, k_h, (((1,), (1,)), ((), ())),
                                    preferred_element_type=f32)            # (S, S)
            s = jnp.where(keep, s, -1e9)
            m = jnp.max(s, axis=-1, keepdims=True)
            p = jnp.exp(s - m)
            denom = jnp.sum(p, axis=-1, keepdims=True)
            o_h = jnp.dot(p.astype(bf16), v_h, preferred_element_type=f32)  # (S, Dh)
            o_h = o_h * pl.reciprocal(denom, approx=True)                   # scale small tensor, EUP
            # fold the per-head output straight into the output projection (no head concat)
            proj_h = jnp.dot(o_h.astype(bf16), w_o_ref[l, lo:hi, :],
                             preferred_element_type=f32)                    # (S, H)
            attn_proj = proj_h if attn_proj is None else attn_proj + proj_h
        x = x + attn_proj + b_o_ref[l]

        # --- MLP block: LN2 -> FF1+GELU -> FF2 -> residual ---
        h2 = layer_norm(x, ln2_g_ref[l], ln2_b_ref[l])
        ff = jnp.dot(h2.astype(bf16), w_ff1_ref[l],
                     preferred_element_type=f32) + b_ff1_ref[l]
        ff = jax.nn.gelu(ff, approximate=True)                              # f32 elementwise
        x = x + jnp.dot(ff.astype(bf16), w_ff2_ref[l],
                        preferred_element_type=f32) + b_ff2_ref[l]

    # ---- final LN + LM head; logits last dim = VOCAB = 256 (lane-dense stores) ----
    hf = layer_norm(x, lnf_g_ref[...], lnf_b_ref[...])
    logits_ref[0] = jnp.dot(hf.astype(bf16), w_lm_ref[...], preferred_element_type=f32)


def _rep_spec(shape):
    """Full-array block, same block for every grid step (weights resident in VMEM)."""
    zeros = (0,) * len(shape)
    return pl.BlockSpec(shape, lambda b, _z=zeros: _z)


# -------------------- parameter init (deterministic, synthetic) --------------------

def init_params(key):
    std = 0.02
    ks = iter(jax.random.split(key, 8 + N_LAYERS * 10))
    p = {
        "wte": std * jax.random.normal(next(ks), (VOCAB, H), jnp.float32),
        "wpe": std * jax.random.normal(next(ks), (S, H), jnp.float32),
        "lnf_g": jnp.ones((H,), jnp.float32),
        "lnf_b": jnp.zeros((H,), jnp.float32),
        "lm_head_w": std * jax.random.normal(next(ks), (H, VOCAB), jnp.float32),
        "layers": [],
    }
    for _ in range(N_LAYERS):
        p["layers"].append({
            "ln1_g": jnp.ones((H,), jnp.float32),
            "ln1_b": jnp.zeros((H,), jnp.float32),
            "w_qkv": std * jax.random.normal(next(ks), (H, 3 * H), jnp.float32),
            "b_qkv": jnp.zeros((3 * H,), jnp.float32),
            "w_o": std * jax.random.normal(next(ks), (H, H), jnp.float32),
            "b_o": jnp.zeros((H,), jnp.float32),
            "ln2_g": jnp.ones((H,), jnp.float32),
            "ln2_b": jnp.zeros((H,), jnp.float32),
            "w_ff1": std * jax.random.normal(next(ks), (H, D_FF), jnp.float32),
            "b_ff1": jnp.zeros((D_FF,), jnp.float32),
            "w_ff2": std * jax.random.normal(next(ks), (D_FF, H), jnp.float32),
            "b_ff2": jnp.zeros((H,), jnp.float32),
        })
    return p


# -------------------- forward (AutoModelMerged.forward equivalent) --------------------

def auto_model_merged_forward(params, input_ids, attention_mask):
    """Full-sequence prefill forward; returns (logits, past_key_values)."""
    # TODO(synk): incremental-decode branch (past_key_values / position_ids inputs) not
    # implemented; only the full-sequence prefill path of the PyTorch forward is reproduced.
    L = params["layers"]
    ids = input_ids.astype(jnp.int32).reshape(B, S, 1)
    pad = attention_mask.astype(jnp.float32).reshape(B, 1, S)

    def stk(name):
        return jnp.stack([lyr[name] for lyr in L])

    # bf16 weights for the MXU inputs; biases / LN params stay f32
    w_qkv = stk("w_qkv").astype(jnp.bfloat16)                   # (L, H, 3H)
    w_o = stk("w_o").astype(jnp.bfloat16)                       # (L, H, H)
    w_ff1 = stk("w_ff1").astype(jnp.bfloat16)                   # (L, H, D_FF)
    w_ff2 = stk("w_ff2").astype(jnp.bfloat16)                   # (L, D_FF, H)
    b_qkv = stk("b_qkv").reshape(N_LAYERS, 1, 3 * H)
    b_o = stk("b_o").reshape(N_LAYERS, 1, H)
    b_ff1 = stk("b_ff1").reshape(N_LAYERS, 1, D_FF)
    b_ff2 = stk("b_ff2").reshape(N_LAYERS, 1, H)
    ln1_g = stk("ln1_g").reshape(N_LAYERS, 1, H)
    ln1_b = stk("ln1_b").reshape(N_LAYERS, 1, H)
    ln2_g = stk("ln2_g").reshape(N_LAYERS, 1, H)
    ln2_b = stk("ln2_b").reshape(N_LAYERS, 1, H)
    lnf_g = params["lnf_g"].reshape(1, H)
    lnf_b = params["lnf_b"].reshape(1, H)
    wte = params["wte"].astype(jnp.float32)                      # f32: exact one-hot gather
    wpe = params["wpe"].astype(jnp.float32)
    w_lm = params["lm_head_w"].astype(jnp.bfloat16)              # (H, VOCAB)

    inputs = (ids, pad, wte, wpe,
              ln1_g, ln1_b, w_qkv, b_qkv, w_o, b_o,
              ln2_g, ln2_b, w_ff1, b_ff1, w_ff2, b_ff2,
              lnf_g, lnf_b, w_lm)

    in_specs = [
        pl.BlockSpec((1, S, 1), lambda b: (b, 0, 0)),            # token ids, per-batch block
        pl.BlockSpec((1, 1, S), lambda b: (b, 0, 0)),            # padding mask row, per-batch block
    ] + [_rep_spec(a.shape) for a in inputs[2:]]

    logits, kv_packed = pl.pallas_call(
        _fused_forward_kernel,
        out_shape=(
            jax.ShapeDtypeStruct((B, S, VOCAB), jnp.float32),
            jax.ShapeDtypeStruct((B, S, KV_PACK), jnp.float32),
        ),
        grid=(B,),
        in_specs=in_specs,
        out_specs=(
            pl.BlockSpec((1, S, VOCAB), lambda b: (b, 0, 0)),
            pl.BlockSpec((1, S, KV_PACK), lambda b: (b, 0, 0)),
        ),
        compiler_params=pltpu.CompilerParams(
            dimension_semantics=("parallel",),   # B=2 -> both v7x TensorCores get work
        ),
    )(*inputs)

    # unpack present K/V to (B, nH, S, Dh) per layer (cheap glue on tiny tensors)
    kv = kv_packed.reshape(B, S, N_LAYERS, 2, N_HEADS, D_HEAD)
    present = tuple(
        (jnp.transpose(kv[:, :, l, 0], (0, 2, 1, 3)),
         jnp.transpose(kv[:, :, l, 1], (0, 2, 1, 3)))
        for l in range(N_LAYERS)
    )
    return logits, present


# -------------------- main --------------------

if __name__ == "__main__":
    key = jax.random.PRNGKey(0)
    k_param, k_ids = jax.random.split(key)

    params = init_params(k_param)
    input_ids = jax.random.randint(k_ids, (B, S), 0, VOCAB, dtype=jnp.int32)
    attention_mask = jnp.ones((B, S), jnp.int32)

    fwd = jax.jit(auto_model_merged_forward)
    logits, past_key_values = fwd(params, input_ids, attention_mask)
    logits = jax.block_until_ready(logits)
    jax.block_until_ready(past_key_values)

    assert logits.shape == (B, S, VOCAB)
    assert logits.dtype == jnp.float32
    assert len(past_key_values) == N_LAYERS
    assert past_key_values[0][0].shape == (B, N_HEADS, S, D_HEAD)
    assert bool(jnp.all(jnp.isfinite(logits)))

    print("KERNEL_OK")
</pallas_src>

<mosaic_0001>
module attributes {stable_mosaic.version = 11 : i64} {
  func.func @_fused_forward_kernel(%arg0: i32, %arg1: memref<1x8x1xi32, #tpu.memory_space<vmem>>, %arg2: memref<1x1x8xf32, #tpu.memory_space<vmem>>, %arg3: memref<256x32xf32, #tpu.memory_space<vmem>>, %arg4: memref<8x32xf32, #tpu.memory_space<vmem>>, %arg5: memref<2x1x32xf32, #tpu.memory_space<vmem>>, %arg6: memref<2x1x32xf32, #tpu.memory_space<vmem>>, %arg7: memref<2x32x96xbf16, #tpu.memory_space<vmem>>, %arg8: memref<2x1x96xf32, #tpu.memory_space<vmem>>, %arg9: memref<2x32x32xbf16, #tpu.memory_space<vmem>>, %arg10: memref<2x1x32xf32, #tpu.memory_space<vmem>>, %arg11: memref<2x1x32xf32, #tpu.memory_space<vmem>>, %arg12: memref<2x1x32xf32, #tpu.memory_space<vmem>>, %arg13: memref<2x32x64xbf16, #tpu.memory_space<vmem>>, %arg14: memref<2x1x64xf32, #tpu.memory_space<vmem>>, %arg15: memref<2x64x32xbf16, #tpu.memory_space<vmem>>, %arg16: memref<2x1x32xf32, #tpu.memory_space<vmem>>, %arg17: memref<1x32xf32, #tpu.memory_space<vmem>>, %arg18: memref<1x32xf32, #tpu.memory_space<vmem>>, %arg19: memref<32x256xbf16, #tpu.memory_space<vmem>>, %arg20: memref<1x8x256xf32, #tpu.memory_space<vmem>>, %arg21: memref<1x8x128xf32, #tpu.memory_space<vmem>>) attributes {dimension_semantics = [#tpu.dimension_semantics<parallel>], iteration_bounds = array<i64: 2>, scalar_prefetch = 0 : i64, scratch_operands = 0 : i64, tpu.core_type = #tpu.core_type<tc>, window_params = [{transform_indices = @transform_0, window_bounds = array<i64: 1, 8, 1>}, {transform_indices = @transform_1, window_bounds = array<i64: 1, 1, 8>}, {pipeline_mode = #tpu.pipeline_mode<synchronous>, transform_indices = @transform_2, window_bounds = array<i64: 256, 32>}, {pipeline_mode = #tpu.pipeline_mode<synchronous>, transform_indices = @transform_3, window_bounds = array<i64: 8, 32>}, {pipeline_mode = #tpu.pipeline_mode<synchronous>, transform_indices = @transform_4, window_bounds = array<i64: 2, 1, 32>}, {pipeline_mode = #tpu.pipeline_mode<synchronous>, transform_indices = @transform_5, window_bounds = array<i64: 2, 1, 32>}, {pipeline_mode = #tpu.pipeline_mode<synchronous>, transform_indices = @transform_6, window_bounds = array<i64: 2, 32, 96>}, {pipeline_mode = #tpu.pipeline_mode<synchronous>, transform_indices = @transform_7, window_bounds = array<i64: 2, 1, 96>}, {pipeline_mode = #tpu.pipeline_mode<synchronous>, transform_indices = @transform_8, window_bounds = array<i64: 2, 32, 32>}, {pipeline_mode = #tpu.pipeline_mode<synchronous>, transform_indices = @transform_9, window_bounds = array<i64: 2, 1, 32>}, {pipeline_mode = #tpu.pipeline_mode<synchronous>, transform_indices = @transform_10, window_bounds = array<i64: 2, 1, 32>}, {pipeline_mode = #tpu.pipeline_mode<synchronous>, transform_indices = @transform_11, window_bounds = array<i64: 2, 1, 32>}, {pipeline_mode = #tpu.pipeline_mode<synchronous>, transform_indices = @transform_12, window_bounds = array<i64: 2, 32, 64>}, {pipeline_mode = #tpu.pipeline_mode<synchronous>, transform_indices = @transform_13, window_bounds = array<i64: 2, 1, 64>}, {pipeline_mode = #tpu.pipeline_mode<synchronous>, transform_indices = @transform_14, window_bounds = array<i64: 2, 64, 32>}, {pipeline_mode = #tpu.pipeline_mode<synchronous>, transform_indices = @transform_15, window_bounds = array<i64: 2, 1, 32>}, {pipeline_mode = #tpu.pipeline_mode<synchronous>, transform_indices = @transform_16, window_bounds = array<i64: 1, 32>}, {pipeline_mode = #tpu.pipeline_mode<synchronous>, transform_indices = @transform_17, window_bounds = array<i64: 1, 32>}, {pipeline_mode = #tpu.pipeline_mode<synchronous>, transform_indices = @transform_18, window_bounds = array<i64: 32, 256>}, {transform_indices = @transform_19, window_bounds = array<i64: 1, 8, 256>}, {transform_indices = @transform_20, window_bounds = array<i64: 1, 8, 128>}]} {
    %c0 = arith.constant 0 : index
    %c0_0 = arith.constant 0 : index
    %c0_1 = arith.constant 0 : index
    %0 = vector.load %arg1[%c0, %c0_0, %c0_1] : memref<1x8x1xi32, #tpu.memory_space<vmem>>, vector<1x8x1xi32>
    %1 = vector.shape_cast %0 : vector<1x8x1xi32> to vector<8x1xi32>
    %2 = tpu.iota {dimensions = array<i32: 1>} : vector<8x256xi32>
    %3 = vector.broadcast %1 : vector<8x1xi32> to vector<8x256xi32>
    %4 = arith.cmpi eq, %3, %2 : vector<8x256xi32>
    %5 = arith.extui %4 : vector<8x256xi1> to vector<8x256xi32>
    %6 = arith.sitofp %5 : vector<8x256xi32> to vector<8x256xf32>
    %c0_2 = arith.constant 0 : index
    %c0_3 = arith.constant 0 : index
    %7 = vector.load %arg3[%c0_2, %c0_3] : memref<256x32xf32, #tpu.memory_space<vmem>>, vector<256x32xf32>
    %cst = arith.constant dense<0.000000e+00> : vector<8x32xf32>
    %8 = tpu.matmul %6, %7, %cst {dimension_numbers = #tpu.dot_dimension_numbers<[1], [0], [0], [1], [0, 0, 1, 1], [], []>} : vector<8x256xf32>, vector<256x32xf32>, vector<8x32xf32> -> vector<8x32xf32>
    %c0_4 = arith.constant 0 : index
    %c0_5 = arith.constant 0 : index
    %9 = vector.load %arg4[%c0_4, %c0_5] : memref<8x32xf32, #tpu.memory_space<vmem>>, vector<8x32xf32>
    %10 = arith.addf %8, %9 : vector<8x32xf32>
    %11 = tpu.iota {dimensions = array<i32: 0>} : vector<8x8xi32>
    %12 = tpu.iota {dimensions = array<i32: 1>} : vector<8x8xi32>
    %13 = arith.cmpi sle, %12, %11 : vector<8x8xi32>
    %c0_6 = arith.constant 0 : index
    %c0_7 = arith.constant 0 : index
    %c0_8 = arith.constant 0 : index
    %14 = vector.load %arg2[%c0_6, %c0_7, %c0_8] : memref<1x1x8xf32, #tpu.memory_space<vmem>>, vector<1x1x8xf32>
    %15 = vector.shape_cast %14 : vector<1x1x8xf32> to vector<1x8xf32>
    %cst_9 = arith.constant 5.000000e-01 : f32
    %16 = vector.broadcast %cst_9 : f32 to vector<1x8xf32>
    %17 = arith.cmpf ogt, %15, %16 : vector<1x8xf32>
    %18 = vector.broadcast %17 : vector<1x8xi1> to vector<8x8xi1>
    %19 = arith.andi %13, %18 : vector<8x8xi1>
    %c0_10 = arith.constant 0 : index
    %c0_11 = arith.constant 0 : index
    %c0_12 = arith.constant 0 : index
    %20 = vector.load %arg5[%c0_10, %c0_11, %c0_12] : memref<2x1x32xf32, #tpu.memory_space<vmem>>, vector<1x1x32xf32>
    %21 = vector.shape_cast %20 : vector<1x1x32xf32> to vector<1x32xf32>
    %c0_13 = arith.constant 0 : index
    %c0_14 = arith.constant 0 : index
    %c0_15 = arith.constant 0 : index
    %22 = vector.load %arg6[%c0_13, %c0_14, %c0_15] : memref<2x1x32xf32, #tpu.memory_space<vmem>>, vector<1x1x32xf32>
    %23 = vector.shape_cast %22 : vector<1x1x32xf32> to vector<1x32xf32>
    %cst_16 = arith.constant dense<0.000000e+00> : vector<8xf32>
    %24 = vector.multi_reduction <add>, %10, %cst_16 [1] : vector<8x32xf32> to vector<8xf32>
    %25 = vector.shape_cast %24 : vector<8xf32> to vector<8x1xf32>
    %cst_17 = arith.constant 3.200000e+01 : f32
    %26 = vector.broadcast %cst_17 : f32 to vector<8x1xf32>
    %27 = arith.divf %25, %26 : vector<8x1xf32>
    %28 = vector.broadcast %27 : vector<8x1xf32> to vector<8x32xf32>
    %29 = arith.subf %10, %28 : vector<8x32xf32>
    %30 = arith.mulf %29, %29 : vector<8x32xf32>
    %cst_18 = arith.constant dense<0.000000e+00> : vector<8xf32>
    %31 = vector.multi_reduction <add>, %30, %cst_18 [1] : vector<8x32xf32> to vector<8xf32>
    %32 = vector.shape_cast %31 : vector<8xf32> to vector<8x1xf32>
    %cst_19 = arith.constant 3.200000e+01 : f32
    %33 = vector.broadcast %cst_19 : f32 to vector<8x1xf32>
    %34 = arith.divf %32, %33 : vector<8x1xf32>
    %cst_20 = arith.constant 9.99999974E-6 : f32
    %35 = vector.broadcast %cst_20 : f32 to vector<8x1xf32>
    %36 = arith.addf %34, %35 : vector<8x1xf32>
    %37 = math.rsqrt %36 : vector<8x1xf32>
    %38 = vector.broadcast %37 : vector<8x1xf32> to vector<8x32xf32>
    %39 = arith.mulf %29, %38 : vector<8x32xf32>
    %40 = vector.broadcast %21 : vector<1x32xf32> to vector<8x32xf32>
    %41 = arith.mulf %39, %40 : vector<8x32xf32>
    %42 = vector.broadcast %23 : vector<1x32xf32> to vector<8x32xf32>
    %43 = arith.addf %41, %42 : vector<8x32xf32>
    %44 = arith.truncf %43 : vector<8x32xf32> to vector<8x32xbf16>
    %c0_21 = arith.constant 0 : index
    %c0_22 = arith.constant 0 : index
    %c0_23 = arith.constant 0 : index
    %45 = vector.load %arg7[%c0_21, %c0_22, %c0_23] : memref<2x32x96xbf16, #tpu.memory_space<vmem>>, vector<1x32x96xbf16>
    %46 = vector.shape_cast %45 : vector<1x32x96xbf16> to vector<32x96xbf16>
    %cst_24 = arith.constant dense<0.000000e+00> : vector<8x96xf32>
    %47 = tpu.matmul %44, %46, %cst_24 {dimension_numbers = #tpu.dot_dimension_numbers<[1], [0], [0], [1], [0, 0, 1, 1], [], []>} : vector<8x32xbf16>, vector<32x96xbf16>, vector<8x96xf32> -> vector<8x96xf32>
    %c0_25 = arith.constant 0 : index
    %c0_26 = arith.constant 0 : index
    %c0_27 = arith.constant 0 : index
    %48 = vector.load %arg8[%c0_25, %c0_26, %c0_27] : memref<2x1x96xf32, #tpu.memory_space<vmem>>, vector<1x1x96xf32>
    %49 = vector.shape_cast %48 : vector<1x1x96xf32> to vector<1x96xf32>
    %50 = vector.broadcast %49 : vector<1x96xf32> to vector<8x96xf32>
    %51 = arith.addf %47, %50 : vector<8x96xf32>
    %52 = vector.extract_strided_slice %51 {offsets = [0, 0], sizes = [8, 32], strides = [1, 1]} : vector<8x96xf32> to vector<8x32xf32>
    %53 = vector.extract_strided_slice %51 {offsets = [0, 32], sizes = [8, 32], strides = [1, 1]} : vector<8x96xf32> to vector<8x32xf32>
    %54 = vector.extract_strided_slice %51 {offsets = [0, 64], sizes = [8, 32], strides = [1, 1]} : vector<8x96xf32> to vector<8x32xf32>
    %55 = vector.extract_strided_slice %51 {offsets = [0, 32], sizes = [8, 64], strides = [1, 1]} : vector<8x96xf32> to vector<8x64xf32>
    %c0_28 = arith.constant 0 : index
    %c0_29 = arith.constant 0 : index
    %c0_30 = arith.constant 0 : index
    %56 = vector.load %arg21[%c0_28, %c0_29, %c0_30] : memref<1x8x128xf32, #tpu.memory_space<vmem>>, vector<1x8x64xf32>
    %57 = vector.shape_cast %56 : vector<1x8x64xf32> to vector<8x64xf32>
    %58 = vector.shape_cast %55 : vector<8x64xf32> to vector<1x8x64xf32>
    tpu.vector_store %arg21[%c0_28, %c0_29, %c0_30], %58 {strides = array<i32>} : memref<1x8x128xf32, #tpu.memory_space<vmem>>, vector<1x8x64xf32>,
    %59 = vector.extract_strided_slice %52 {offsets = [0, 0], sizes = [8, 16], strides = [1, 1]} : vector<8x32xf32> to vector<8x16xf32>
    %cst_31 = arith.constant 2.500000e-01 : f32
    %60 = vector.broadcast %cst_31 : f32 to vector<8x16xf32>
    %61 = arith.mulf %59, %60 : vector<8x16xf32>
    %62 = arith.truncf %61 : vector<8x16xf32> to vector<8x16xbf16>
    %63 = vector.extract_strided_slice %53 {offsets = [0, 0], sizes = [8, 16], strides = [1, 1]} : vector<8x32xf32> to vector<8x16xf32>
    %64 = arith.truncf %63 : vector<8x16xf32> to vector<8x16xbf16>
    %65 = vector.extract_strided_slice %54 {offsets = [0, 0], sizes = [8, 16], strides = [1, 1]} : vector<8x32xf32> to vector<8x16xf32>
    %66 = arith.truncf %65 : vector<8x16xf32> to vector<8x16xbf16>
    %cst_32 = arith.constant dense<0.000000e+00> : vector<8x8xf32>
    %67 = tpu.matmul %62, %64, %cst_32 {dimension_numbers = #tpu.dot_dimension_numbers<[1], [1], [0], [0], [0, 0, 1, 0], [], []>} : vector<8x16xbf16>, vector<8x16xbf16>, vector<8x8xf32> -> vector<8x8xf32>
    %cst_33 = arith.constant -1.000000e+09 : f32
    %68 = vector.broadcast %cst_33 : f32 to vector<8x8xf32>
    %69 = arith.select %19, %67, %68 : vector<8x8xi1>, vector<8x8xf32>
    %cst_34 = arith.constant dense<0xFF800000> : vector<8xf32>
    %70 = vector.multi_reduction <maximumf>, %69, %cst_34 [1] : vector<8x8xf32> to vector<8xf32>
    %71 = vector.shape_cast %70 : vector<8xf32> to vector<8x1xf32>
    %72 = vector.broadcast %71 : vector<8x1xf32> to vector<8x8xf32>
    %73 = arith.subf %69, %72 : vector<8x8xf32>
    %74 = math.exp %73 : vector<8x8xf32>
    %cst_35 = arith.constant dense<0.000000e+00> : vector<8xf32>
    %75 = vector.multi_reduction <add>, %74, %cst_35 [1] : vector<8x8xf32> to vector<8xf32>
    %76 = vector.shape_cast %75 : vector<8xf32> to vector<8x1xf32>
    %77 = arith.truncf %74 : vector<8x8xf32> to vector<8x8xbf16>
    %cst_36 = arith.constant dense<0.000000e+00> : vector<8x16xf32>
    %78 = tpu.matmul %77, %66, %cst_36 {dimension_numbers = #tpu.dot_dimension_numbers<[1], [0], [0], [1], [0, 0, 1, 1], [], []>} : vector<8x8xbf16>, vector<8x16xbf16>, vector<8x16xf32> -> vector<8x16xf32>
    %79 = tpu.reciprocal %76 {approx = true} : vector<8x1xf32> -> vector<8x1xf32>
    %80 = vector.broadcast %79 : vector<8x1xf32> to vector<8x16xf32>
    %81 = arith.mulf %78, %80 : vector<8x16xf32>
    %82 = arith.truncf %81 : vector<8x16xf32> to vector<8x16xbf16>
    %c0_37 = arith.constant 0 : index
    %c0_38 = arith.constant 0 : index
    %c0_39 = arith.constant 0 : index
    %83 = vector.load %arg9[%c0_37, %c0_38, %c0_39] : memref<2x32x32xbf16, #tpu.memory_space<vmem>>, vector<1x16x32xbf16>
    %84 = vector.shape_cast %83 : vector<1x16x32xbf16> to vector<16x32xbf16>
    %cst_40 = arith.constant dense<0.000000e+00> : vector<8x32xf32>
    %85 = tpu.matmul %82, %84, %cst_40 {dimension_numbers = #tpu.dot_dimension_numbers<[1], [0], [0], [1], [0, 0, 1, 1], [], []>} : vector<8x16xbf16>, vector<16x32xbf16>, vector<8x32xf32> -> vector<8x32xf32>
    %86 = vector.extract_strided_slice %52 {offsets = [0, 16], sizes = [8, 16], strides = [1, 1]} : vector<8x32xf32> to vector<8x16xf32>
    %cst_41 = arith.constant 2.500000e-01 : f32
    %87 = vector.broadcast %cst_41 : f32 to vector<8x16xf32>
    %88 = arith.mulf %86, %87 : vector<8x16xf32>
    %89 = arith.truncf %88 : vector<8x16xf32> to vector<8x16xbf16>
    %90 = vector.extract_strided_slice %53 {offsets = [0, 16], sizes = [8, 16], strides = [1, 1]} : vector<8x32xf32> to vector<8x16xf32>
    %91 = arith.truncf %90 : vector<8x16xf32> to vector<8x16xbf16>
    %92 = vector.extract_strided_slice %54 {offsets = [0, 16], sizes = [8, 16], strides = [1, 1]} : vector<8x32xf32> to vector<8x16xf32>
    %93 = arith.truncf %92 : vector<8x16xf32> to vector<8x16xbf16>
    %cst_42 = arith.constant dense<0.000000e+00> : vector<8x8xf32>
    %94 = tpu.matmul %89, %91, %cst_42 {dimension_numbers = #tpu.dot_dimension_numbers<[1], [1], [0], [0], [0, 0, 1, 0], [], []>} : vector<8x16xbf16>, vector<8x16xbf16>, vector<8x8xf32> -> vector<8x8xf32>
    %cst_43 = arith.constant -1.000000e+09 : f32
    %95 = vector.broadcast %cst_43 : f32 to vector<8x8xf32>
    %96 = arith.select %19, %94, %95 : vector<8x8xi1>, vector<8x8xf32>
    %cst_44 = arith.constant dense<0xFF800000> : vector<8xf32>
    %97 = vector.multi_reduction <maximumf>, %96, %cst_44 [1] : vector<8x8xf32> to vector<8xf32>
    %98 = vector.shape_cast %97 : vector<8xf32> to vector<8x1xf32>
    %99 = vector.broadcast %98 : vector<8x1xf32> to vector<8x8xf32>
    %100 = arith.subf %96, %99 : vector<8x8xf32>
    %101 = math.exp %100 : vector<8x8xf32>
    %cst_45 = arith.constant dense<0.000000e+00> : vector<8xf32>
    %102 = vector.multi_reduction <add>, %101, %cst_45 [1] : vector<8x8xf32> to vector<8xf32>
    %103 = vector.shape_cast %102 : vector<8xf32> to vector<8x1xf32>
    %104 = arith.truncf %101 : vector<8x8xf32> to vector<8x8xbf16>
    %cst_46 = arith.constant dense<0.000000e+00> : vector<8x16xf32>
    %105 = tpu.matmul %104, %93, %cst_46 {dimension_numbers = #tpu.dot_dimension_numbers<[1], [0], [0], [1], [0, 0, 1, 1], [], []>} : vector<8x8xbf16>, vector<8x16xbf16>, vector<8x16xf32> -> vector<8x16xf32>
    %106 = tpu.reciprocal %103 {approx = true} : vector<8x1xf32> -> vector<8x1xf32>
    %107 = vector.broadcast %106 : vector<8x1xf32> to vector<8x16xf32>
    %108 = arith.mulf %105, %107 : vector<8x16xf32>
    %109 = arith.truncf %108 : vector<8x16xf32> to vector<8x16xbf16>
    %c0_47 = arith.constant 0 : index
    %c16 = arith.constant 16 : index
    %c0_48 = arith.constant 0 : index
    %110 = vector.load %arg9[%c0_47, %c16, %c0_48] : memref<2x32x32xbf16, #tpu.memory_space<vmem>>, vector<1x16x32xbf16>
    %111 = vector.shape_cast %110 : vector<1x16x32xbf16> to vector<16x32xbf16>
    %cst_49 = arith.constant dense<0.000000e+00> : vector<8x32xf32>
    %112 = tpu.matmul %109, %111, %cst_49 {dimension_numbers = #tpu.dot_dimension_numbers<[1], [0], [0], [1], [0, 0, 1, 1], [], []>} : vector<8x16xbf16>, vector<16x32xbf16>, vector<8x32xf32> -> vector<8x32xf32>
    %113 = arith.addf %85, %112 : vector<8x32xf32>
    %114 = arith.addf %10, %113 : vector<8x32xf32>
    %c0_50 = arith.constant 0 : index
    %c0_51 = arith.constant 0 : index
    %c0_52 = arith.constant 0 : index
    %115 = vector.load %arg10[%c0_50, %c0_51, %c0_52] : memref<2x1x32xf32, #tpu.memory_space<vmem>>, vector<1x1x32xf32>
    %116 = vector.shape_cast %115 : vector<1x1x32xf32> to vector<1x32xf32>
    %117 = vector.broadcast %116 : vector<1x32xf32> to vector<8x32xf32>
    %118 = arith.addf %114, %117 : vector<8x32xf32>
    %c0_53 = arith.constant 0 : index
    %c0_54 = arith.constant 0 : index
    %c0_55 = arith.constant 0 : index
    %119 = vector.load %arg11[%c0_53, %c0_54, %c0_55] : memref<2x1x32xf32, #tpu.memory_space<vmem>>, vector<1x1x32xf32>
    %120 = vector.shape_cast %119 : vector<1x1x32xf32> to vector<1x32xf32>
    %c0_56 = arith.constant 0 : index
    %c0_57 = arith.constant 0 : index
    %c0_58 = arith.constant 0 : index
    %121 = vector.load %arg12[%c0_56, %c0_57, %c0_58] : memref<2x1x32xf32, #tpu.memory_space<vmem>>, vector<1x1x32xf32>
    %122 = vector.shape_cast %121 : vector<1x1x32xf32> to vector<1x32xf32>
    %cst_59 = arith.constant dense<0.000000e+00> : vector<8xf32>
    %123 = vector.multi_reduction <add>, %118, %cst_59 [1] : vector<8x32xf32> to vector<8xf32>
    %124 = vector.shape_cast %123 : vector<8xf32> to vector<8x1xf32>
    %cst_60 = arith.constant 3.200000e+01 : f32
    %125 = vector.broadcast %cst_60 : f32 to vector<8x1xf32>
    %126 = arith.divf %124, %125 : vector<8x1xf32>
    %127 = vector.broadcast %126 : vector<8x1xf32> to vector<8x32xf32>
    %128 = arith.subf %118, %127 : vector<8x32xf32>
    %129 = arith.mulf %128, %128 : vector<8x32xf32>
    %cst_61 = arith.constant dense<0.000000e+00> : vector<8xf32>
    %130 = vector.multi_reduction <add>, %129, %cst_61 [1] : vector<8x32xf32> to vector<8xf32>
    %131 = vector.shape_cast %130 : vector<8xf32> to vector<8x1xf32>
    %cst_62 = arith.constant 3.200000e+01 : f32
    %132 = vector.broadcast %cst_62 : f32 to vector<8x1xf32>
    %133 = arith.divf %131, %132 : vector<8x1xf32>
    %cst_63 = arith.constant 9.99999974E-6 : f32
    %134 = vector.broadcast %cst_63 : f32 to vector<8x1xf32>
    %135 = arith.addf %133, %134 : vector<8x1xf32>
    %136 = math.rsqrt %135 : vector<8x1xf32>
    %137 = vector.broadcast %136 : vector<8x1xf32> to vector<8x32xf32>
    %138 = arith.mulf %128, %137 : vector<8x32xf32>
    %139 = vector.broadcast %120 : vector<1x32xf32> to vector<8x32xf32>
    %140 = arith.mulf %138, %139 : vector<8x32xf32>
    %141 = vector.broadcast %122 : vector<1x32xf32> to vector<8x32xf32>
    %142 = arith.addf %140, %141 : vector<8x32xf32>
    %143 = arith.truncf %142 : vector<8x32xf32> to vector<8x32xbf16>
    %c0_64 = arith.constant 0 : index
    %c0_65 = arith.constant 0 : index
    %c0_66 = arith.constant 0 : index
    %144 = vector.load %arg13[%c0_64, %c0_65, %c0_66] : memref<2x32x64xbf16, #tpu.memory_space<vmem>>, vector<1x32x64xbf16>
    %145 = vector.shape_cast %144 : vector<1x32x64xbf16> to vector<32x64xbf16>
    %cst_67 = arith.constant dense<0.000000e+00> : vector<8x64xf32>
    %146 = tpu.matmul %143, %145, %cst_67 {dimension_numbers = #tpu.dot_dimension_numbers<[1], [0], [0], [1], [0, 0, 1, 1], [], []>} : vector<8x32xbf16>, vector<32x64xbf16>, vector<8x64xf32> -> vector<8x64xf32>
    %c0_68 = arith.constant 0 : index
    %c0_69 = arith.constant 0 : index
    %c0_70 = arith.constant 0 : index
    %147 = vector.load %arg14[%c0_68, %c0_69, %c0_70] : memref<2x1x64xf32, #tpu.memory_space<vmem>>, vector<1x1x64xf32>
    %148 = vector.shape_cast %147 : vector<1x1x64xf32> to vector<1x64xf32>
    %149 = vector.broadcast %148 : vector<1x64xf32> to vector<8x64xf32>
    %150 = arith.addf %146, %149 : vector<8x64xf32>
    %151 = arith.mulf %150, %150 : vector<8x64xf32>
    %152 = arith.mulf %150, %151 : vector<8x64xf32>
    %cst_71 = arith.constant 4.471500e-02 : f32
    %153 = vector.broadcast %cst_71 : f32 to vector<8x64xf32>
    %154 = arith.mulf %153, %152 : vector<8x64xf32>
    %155 = arith.addf %150, %154 : vector<8x64xf32>
    %cst_72 = arith.constant 0.797884583 : f32
    %156 = vector.broadcast %cst_72 : f32 to vector<8x64xf32>
    %157 = arith.mulf %156, %155 : vector<8x64xf32>
    %158 = math.tanh %157 : vector<8x64xf32>
    %cst_73 = arith.constant 1.000000e+00 : f32
    %159 = vector.broadcast %cst_73 : f32 to vector<8x64xf32>
    %160 = arith.addf %159, %158 : vector<8x64xf32>
    %cst_74 = arith.constant 5.000000e-01 : f32
    %161 = vector.broadcast %cst_74 : f32 to vector<8x64xf32>
    %162 = arith.mulf %161, %160 : vector<8x64xf32>
    %163 = arith.mulf %150, %162 : vector<8x64xf32>
    %164 = arith.truncf %163 : vector<8x64xf32> to vector<8x64xbf16>
    %c0_75 = arith.constant 0 : index
    %c0_76 = arith.constant 0 : index
    %c0_77 = arith.constant 0 : index
    %165 = vector.load %arg15[%c0_75, %c0_76, %c0_77] : memref<2x64x32xbf16, #tpu.memory_space<vmem>>, vector<1x64x32xbf16>
    %166 = vector.shape_cast %165 : vector<1x64x32xbf16> to vector<64x32xbf16>
    %cst_78 = arith.constant dense<0.000000e+00> : vector<8x32xf32>
    %167 = tpu.matmul %164, %166, %cst_78 {dimension_numbers = #tpu.dot_dimension_numbers<[1], [0], [0], [1], [0, 0, 1, 1], [], []>} : vector<8x64xbf16>, vector<64x32xbf16>, vector<8x32xf32> -> vector<8x32xf32>
    %168 = arith.addf %118, %167 : vector<8x32xf32>
    %c0_79 = arith.constant 0 : index
    %c0_80 = arith.constant 0 : index
    %c0_81 = arith.constant 0 : index
    %169 = vector.load %arg16[%c0_79, %c0_80, %c0_81] : memref<2x1x32xf32, #tpu.memory_space<vmem>>, vector<1x1x32xf32>
    %170 = vector.shape_cast %169 : vector<1x1x32xf32> to vector<1x32xf32>
    %171 = vector.broadcast %170 : vector<1x32xf32> to vector<8x32xf32>
    %172 = arith.addf %168, %171 : vector<8x32xf32>
    %c1 = arith.constant 1 : index
    %c0_82 = arith.constant 0 : index
    %c0_83 = arith.constant 0 : index
    %173 = vector.load %arg5[%c1, %c0_82, %c0_83] : memref<2x1x32xf32, #tpu.memory_space<vmem>>, vector<1x1x32xf32>
    %174 = vector.shape_cast %173 : vector<1x1x32xf32> to vector<1x32xf32>
    %c1_84 = arith.constant 1 : index
    %c0_85 = arith.constant 0 : index
    %c0_86 = arith.constant 0 : index
    %175 = vector.load %arg6[%c1_84, %c0_85, %c0_86] : memref<2x1x32xf32, #tpu.memory_space<vmem>>, vector<1x1x32xf32>
    %176 = vector.shape_cast %175 : vector<1x1x32xf32> to vector<1x32xf32>
    %cst_87 = arith.constant dense<0.000000e+00> : vector<8xf32>
    %177 = vector.multi_reduction <add>, %172, %cst_87 [1] : vector<8x32xf32> to vector<8xf32>
    %178 = vector.shape_cast %177 : vector<8xf32> to vector<8x1xf32>
    %cst_88 = arith.constant 3.200000e+01 : f32
    %179 = vector.broadcast %cst_88 : f32 to vector<8x1xf32>
    %180 = arith.divf %178, %179 : vector<8x1xf32>
    %181 = vector.broadcast %180 : vector<8x1xf32> to vector<8x32xf32>
    %182 = arith.subf %172, %181 : vector<8x32xf32>
    %183 = arith.mulf %182, %182 : vector<8x32xf32>
    %cst_89 = arith.constant dense<0.000000e+00> : vector<8xf32>
    %184 = vector.multi_reduction <add>, %183, %cst_89 [1] : vector<8x32xf32> to vector<8xf32>
    %185 = vector.shape_cast %184 : vector<8xf32> to vector<8x1xf32>
    %cst_90 = arith.constant 3.200000e+01 : f32
    %186 = vector.broadcast %cst_90 : f32 to vector<8x1xf32>
    %187 = arith.divf %185, %186 : vector<8x1xf32>
    %cst_91 = arith.constant 9.99999974E-6 : f32
    %188 = vector.broadcast %cst_91 : f32 to vector<8x1xf32>
    %189 = arith.addf %187, %188 : vector<8x1xf32>
    %190 = math.rsqrt %189 : vector<8x1xf32>
    %191 = vector.broadcast %190 : vector<8x1xf32> to vector<8x32xf32>
    %192 = arith.mulf %182, %191 : vector<8x32xf32>
    %193 = vector.broadcast %174 : vector<1x32xf32> to vector<8x32xf32>
    %194 = arith.mulf %192, %193 : vector<8x32xf32>
    %195 = vector.broadcast %176 : vector<1x32xf32> to vector<8x32xf32>
    %196 = arith.addf %194, %195 : vector<8x32xf32>
    %197 = arith.truncf %196 : vector<8x32xf32> to vector<8x32xbf16>
    %c1_92 = arith.constant 1 : index
    %c0_93 = arith.constant 0 : index
    %c0_94 = arith.constant 0 : index
    %198 = vector.load %arg7[%c1_92, %c0_93, %c0_94] : memref<2x32x96xbf16, #tpu.memory_space<vmem>>, vector<1x32x96xbf16>
    %199 = vector.shape_cast %198 : vector<1x32x96xbf16> to vector<32x96xbf16>
    %cst_95 = arith.constant dense<0.000000e+00> : vector<8x96xf32>
    %200 = tpu.matmul %197, %199, %cst_95 {dimension_numbers = #tpu.dot_dimension_numbers<[1], [0], [0], [1], [0, 0, 1, 1], [], []>} : vector<8x32xbf16>, vector<32x96xbf16>, vector<8x96xf32> -> vector<8x96xf32>
    %c1_96 = arith.constant 1 : index
    %c0_97 = arith.constant 0 : index
    %c0_98 = arith.constant 0 : index
    %201 = vector.load %arg8[%c1_96, %c0_97, %c0_98] : memref<2x1x96xf32, #tpu.memory_space<vmem>>, vector<1x1x96xf32>
    %202 = vector.shape_cast %201 : vector<1x1x96xf32> to vector<1x96xf32>
    %203 = vector.broadcast %202 : vector<1x96xf32> to vector<8x96xf32>
    %204 = arith.addf %200, %203 : vector<8x96xf32>
    %205 = vector.extract_strided_slice %204 {offsets = [0, 0], sizes = [8, 32], strides = [1, 1]} : vector<8x96xf32> to vector<8x32xf32>
    %206 = vector.extract_strided_slice %204 {offsets = [0, 32], sizes = [8, 32], strides = [1, 1]} : vector<8x96xf32> to vector<8x32xf32>
    %207 = vector.extract_strided_slice %204 {offsets = [0, 64], sizes = [8, 32], strides = [1, 1]} : vector<8x96xf32> to vector<8x32xf32>
    %208 = vector.extract_strided_slice %204 {offsets = [0, 32], sizes = [8, 64], strides = [1, 1]} : vector<8x96xf32> to vector<8x64xf32>
    %c0_99 = arith.constant 0 : index
    %c0_100 = arith.constant 0 : index
    %c64 = arith.constant 64 : index
    %209 = vector.load %arg21[%c0_99, %c0_100, %c64] : memref<1x8x128xf32, #tpu.memory_space<vmem>>, vector<1x8x64xf32>
    %210 = vector.shape_cast %209 : vector<1x8x64xf32> to vector<8x64xf32>
    %211 = vector.shape_cast %208 : vector<8x64xf32> to vector<1x8x64xf32>
    tpu.vector_store %arg21[%c0_99, %c0_100, %c64], %211 {strides = array<i32>} : memref<1x8x128xf32, #tpu.memory_space<vmem>>, vector<1x8x64xf32>,
    %212 = vector.extract_strided_slice %205 {offsets = [0, 0], sizes = [8, 16], strides = [1, 1]} : vector<8x32xf32> to vector<8x16xf32>
    %cst_101 = arith.constant 2.500000e-01 : f32
    %213 = vector.broadcast %cst_101 : f32 to vector<8x16xf32>
    %214 = arith.mulf %212, %213 : vector<8x16xf32>
    %215 = arith.truncf %214 : vector<8x16xf32> to vector<8x16xbf16>
    %216 = vector.extract_strided_slice %206 {offsets = [0, 0], sizes = [8, 16], strides = [1, 1]} : vector<8x32xf32> to vector<8x16xf32>
    %217 = arith.truncf %216 : vector<8x16xf32> to vector<8x16xbf16>
    %218 = vector.extract_strided_slice %207 {offsets = [0, 0], sizes = [8, 16], strides = [1, 1]} : vector<8x32xf32> to vector<8x16xf32>
    %219 = arith.truncf %218 : vector<8x16xf32> to vector<8x16xbf16>
    %cst_102 = arith.constant dense<0.000000e+00> : vector<8x8xf32>
    %220 = tpu.matmul %215, %217, %cst_102 {dimension_numbers = #tpu.dot_dimension_numbers<[1], [1], [0], [0], [0, 0, 1, 0], [], []>} : vector<8x16xbf16>, vector<8x16xbf16>, vector<8x8xf32> -> vector<8x8xf32>
    %cst_103 = arith.constant -1.000000e+09 : f32
    %221 = vector.broadcast %cst_103 : f32 to vector<8x8xf32>
    %222 = arith.select %19, %220, %221 : vector<8x8xi1>, vector<8x8xf32>
    %cst_104 = arith.constant dense<0xFF800000> : vector<8xf32>
    %223 = vector.multi_reduction <maximumf>, %222, %cst_104 [1] : vector<8x8xf32> to vector<8xf32>
    %224 = vector.shape_cast %223 : vector<8xf32> to vector<8x1xf32>
    %225 = vector.broadcast %224 : vector<8x1xf32> to vector<8x8xf32>
    %226 = arith.subf %222, %225 : vector<8x8xf32>
    %227 = math.exp %226 : vector<8x8xf32>
    %cst_105 = arith.constant dense<0.000000e+00> : vector<8xf32>
    %228 = vector.multi_reduction <add>, %227, %cst_105 [1] : vector<8x8xf32> to vector<8xf32>
    %229 = vector.shape_cast %228 : vector<8xf32> to vector<8x1xf32>
    %230 = arith.truncf %227 : vector<8x8xf32> to vector<8x8xbf16>
    %cst_106 = arith.constant dense<0.000000e+00> : vector<8x16xf32>
    %231 = tpu.matmul %230, %219, %cst_106 {dimension_numbers = #tpu.dot_dimension_numbers<[1], [0], [0], [1], [0, 0, 1, 1], [], []>} : vector<8x8xbf16>, vector<8x16xbf16>, vector<8x16xf32> -> vector<8x16xf32>
    %232 = tpu.reciprocal %229 {approx = true} : vector<8x1xf32> -> vector<8x1xf32>
    %233 = vector.broadcast %232 : vector<8x1xf32> to vector<8x16xf32>
    %234 = arith.mulf %231, %233 : vector<8x16xf32>
    %235 = arith.truncf %234 : vector<8x16xf32> to vector<8x16xbf16>
    %c1_107 = arith.constant 1 : index
    %c0_108 = arith.constant 0 : index
    %c0_109 = arith.constant 0 : index
    %236 = vector.load %arg9[%c1_107, %c0_108, %c0_109] : memref<2x32x32xbf16, #tpu.memory_space<vmem>>, vector<1x16x32xbf16>
    %237 = vector.shape_cast %236 : vector<1x16x32xbf16> to vector<16x32xbf16>
    %cst_110 = arith.constant dense<0.000000e+00> : vector<8x32xf32>
    %238 = tpu.matmul %235, %237, %cst_110 {dimension_numbers = #tpu.dot_dimension_numbers<[1], [0], [0], [1], [0, 0, 1, 1], [], []>} : vector<8x16xbf16>, vector<16x32xbf16>, vector<8x32xf32> -> vector<8x32xf32>
    %239 = vector.extract_strided_slice %205 {offsets = [0, 16], sizes = [8, 16], strides = [1, 1]} : vector<8x32xf32> to vector<8x16xf32>
    %cst_111 = arith.constant 2.500000e-01 : f32
    %240 = vector.broadcast %cst_111 : f32 to vector<8x16xf32>
    %241 = arith.mulf %239, %240 : vector<8x16xf32>
    %242 = arith.truncf %241 : vector<8x16xf32> to vector<8x16xbf16>
    %243 = vector.extract_strided_slice %206 {offsets = [0, 16], sizes = [8, 16], strides = [1, 1]} : vector<8x32xf32> to vector<8x16xf32>
    %244 = arith.truncf %243 : vector<8x16xf32> to vector<8x16xbf16>
    %245 = vector.extract_strided_slice %207 {offsets = [0, 16], sizes = [8, 16], strides = [1, 1]} : vector<8x32xf32> to vector<8x16xf32>
    %246 = arith.truncf %245 : vector<8x16xf32> to vector<8x16xbf16>
    %cst_112 = arith.constant dense<0.000000e+00> : vector<8x8xf32>
    %247 = tpu.matmul %242, %244, %cst_112 {dimension_numbers = #tpu.dot_dimension_numbers<[1], [1], [0], [0], [0, 0, 1, 0], [], []>} : vector<8x16xbf16>, vector<8x16xbf16>, vector<8x8xf32> -> vector<8x8xf32>
    %cst_113 = arith.constant -1.000000e+09 : f32
    %248 = vector.broadcast %cst_113 : f32 to vector<8x8xf32>
    %249 = arith.select %19, %247, %248 : vector<8x8xi1>, vector<8x8xf32>
    %cst_114 = arith.constant dense<0xFF800000> : vector<8xf32>
    %250 = vector.multi_reduction <maximumf>, %249, %cst_114 [1] : vector<8x8xf32> to vector<8xf32>
    %251 = vector.shape_cast %250 : vector<8xf32> to vector<8x1xf32>
    %252 = vector.broadcast %251 : vector<8x1xf32> to vector<8x8xf32>
    %253 = arith.subf %249, %252 : vector<8x8xf32>
    %254 = math.exp %253 : vector<8x8xf32>
    %cst_115 = arith.constant dense<0.000000e+00> : vector<8xf32>
    %255 = vector.multi_reduction <add>, %254, %cst_115 [1] : vector<8x8xf32> to vector<8xf32>
    %256 = vector.shape_cast %255 : vector<8xf32> to vector<8x1xf32>
    %257 = arith.truncf %254 : vector<8x8xf32> to vector<8x8xbf16>
    %cst_116 = arith.constant dense<0.000000e+00> : vector<8x16xf32>
    %258 = tpu.matmul %257, %246, %cst_116 {dimension_numbers = #tpu.dot_dimension_numbers<[1], [0], [0], [1], [0, 0, 1, 1], [], []>} : vector<8x8xbf16>, vector<8x16xbf16>, vector<8x16xf32> -> vector<8x16xf32>
    %259 = tpu.reciprocal %256 {approx = true} : vector<8x1xf32> -> vector<8x1xf32>
    %260 = vector.broadcast %259 : vector<8x1xf32> to vector<8x16xf32>
    %261 = arith.mulf %258, %260 : vector<8x16xf32>
    %262 = arith.truncf %261 : vector<8x16xf32> to vector<8x16xbf16>
    %c1_117 = arith.constant 1 : index
    %c16_118 = arith.constant 16 : index
    %c0_119 = arith.constant 0 : index
    %263 = vector.load %arg9[%c1_117, %c16_118, %c0_119] : memref<2x32x32xbf16, #tpu.memory_space<vmem>>, vector<1x16x32xbf16>
    %264 = vector.shape_cast %263 : vector<1x16x32xbf16> to vector<16x32xbf16>
    %cst_120 = arith.constant dense<0.000000e+00> : vector<8x32xf32>
    %265 = tpu.matmul %262, %264, %cst_120 {dimension_numbers = #tpu.dot_dimension_numbers<[1], [0], [0], [1], [0, 0, 1, 1], [], []>} : vector<8x16xbf16>, vector<16x32xbf16>, vector<8x32xf32> -> vector<8x32xf32>
    %266 = arith.addf %238, %265 : vector<8x32xf32>
    %267 = arith.addf %172, %266 : vector<8x32xf32>
    %c1_121 = arith.constant 1 : index
    %c0_122 = arith.constant 0 : index
    %c0_123 = arith.constant 0 : index
    %268 = vector.load %arg10[%c1_121, %c0_122, %c0_123] : memref<2x1x32xf32, #tpu.memory_space<vmem>>, vector<1x1x32xf32>
    %269 = vector.shape_cast %268 : vector<1x1x32xf32> to vector<1x32xf32>
    %270 = vector.broadcast %269 : vector<1x32xf32> to vector<8x32xf32>
    %271 = arith.addf %267, %270 : vector<8x32xf32>
    %c1_124 = arith.constant 1 : index
    %c0_125 = arith.constant 0 : index
    %c0_126 = arith.constant 0 : index
    %272 = vector.load %arg11[%c1_124, %c0_125, %c0_126] : memref<2x1x32xf32, #tpu.memory_space<vmem>>, vector<1x1x32xf32>
    %273 = vector.shape_cast %272 : vector<1x1x32xf32> to vector<1x32xf32>
    %c1_127 = arith.constant 1 : index
    %c0_128 = arith.constant 0 : index
    %c0_129 = arith.constant 0 : index
    %274 = vector.load %arg12[%c1_127, %c0_128, %c0_129] : memref<2x1x32xf32, #tpu.memory_space<vmem>>, vector<1x1x32xf32>
    %275 = vector.shape_cast %274 : vector<1x1x32xf32> to vector<1x32xf32>
    %cst_130 = arith.constant dense<0.000000e+00> : vector<8xf32>
    %276 = vector.multi_reduction <add>, %271, %cst_130 [1] : vector<8x32xf32> to vector<8xf32>
    %277 = vector.shape_cast %276 : vector<8xf32> to vector<8x1xf32>
    %cst_131 = arith.constant 3.200000e+01 : f32
    %278 = vector.broadcast %cst_131 : f32 to vector<8x1xf32>
    %279 = arith.divf %277, %278 : vector<8x1xf32>
    %280 = vector.broadcast %279 : vector<8x1xf32> to vector<8x32xf32>
    %281 = arith.subf %271, %280 : vector<8x32xf32>
    %282 = arith.mulf %281, %281 : vector<8x32xf32>
    %cst_132 = arith.constant dense<0.000000e+00> : vector<8xf32>
    %283 = vector.multi_reduction <add>, %282, %cst_132 [1] : vector<8x32xf32> to vector<8xf32>
    %284 = vector.shape_cast %283 : vector<8xf32> to vector<8x1xf32>
    %cst_133 = arith.constant 3.200000e+01 : f32
    %285 = vector.broadcast %cst_133 : f32 to vector<8x1xf32>
    %286 = arith.divf %284, %285 : vector<8x1xf32>
    %cst_134 = arith.constant 9.99999974E-6 : f32
    %287 = vector.broadcast %cst_134 : f32 to vector<8x1xf32>
    %288 = arith.addf %286, %287 : vector<8x1xf32>
    %289 = math.rsqrt %288 : vector<8x1xf32>
    %290 = vector.broadcast %289 : vector<8x1xf32> to vector<8x32xf32>
    %291 = arith.mulf %281, %290 : vector<8x32xf32>
    %292 = vector.broadcast %273 : vector<1x32xf32> to vector<8x32xf32>
    %293 = arith.mulf %291, %292 : vector<8x32xf32>
    %294 = vector.broadcast %275 : vector<1x32xf32> to vector<8x32xf32>
    %295 = arith.addf %293, %294 : vector<8x32xf32>
    %296 = arith.truncf %295 : vector<8x32xf32> to vector<8x32xbf16>
    %c1_135 = arith.constant 1 : index
    %c0_136 = arith.constant 0 : index
    %c0_137 = arith.constant 0 : index
    %297 = vector.load %arg13[%c1_135, %c0_136, %c0_137] : memref<2x32x64xbf16, #tpu.memory_space<vmem>>, vector<1x32x64xbf16>
    %298 = vector.shape_cast %297 : vector<1x32x64xbf16> to vector<32x64xbf16>
    %cst_138 = arith.constant dense<0.000000e+00> : vector<8x64xf32>
    %299 = tpu.matmul %296, %298, %cst_138 {dimension_numbers = #tpu.dot_dimension_numbers<[1], [0], [0], [1], [0, 0, 1, 1], [], []>} : vector<8x32xbf16>, vector<32x64xbf16>, vector<8x64xf32> -> vector<8x64xf32>
    %c1_139 = arith.constant 1 : index
    %c0_140 = arith.constant 0 : index
    %c0_141 = arith.constant 0 : index
    %300 = vector.load %arg14[%c1_139, %c0_140, %c0_141] : memref<2x1x64xf32, #tpu.memory_space<vmem>>, vector<1x1x64xf32>
    %301 = vector.shape_cast %300 : vector<1x1x64xf32> to vector<1x64xf32>
    %302 = vector.broadcast %301 : vector<1x64xf32> to vector<8x64xf32>
    %303 = arith.addf %299, %302 : vector<8x64xf32>
    %304 = arith.mulf %303, %303 : vector<8x64xf32>
    %305 = arith.mulf %303, %304 : vector<8x64xf32>
    %cst_142 = arith.constant 4.471500e-02 : f32
    %306 = vector.broadcast %cst_142 : f32 to vector<8x64xf32>
    %307 = arith.mulf %306, %305 : vector<8x64xf32>
    %308 = arith.addf %303, %307 : vector<8x64xf32>
    %cst_143 = arith.constant 0.797884583 : f32
    %309 = vector.broadcast %cst_143 : f32 to vector<8x64xf32>
    %310 = arith.mulf %309, %308 : vector<8x64xf32>
    %311 = math.tanh %310 : vector<8x64xf32>
    %cst_144 = arith.constant 1.000000e+00 : f32
    %312 = vector.broadcast %cst_144 : f32 to vector<8x64xf32>
    %313 = arith.addf %312, %311 : vector<8x64xf32>
    %cst_145 = arith.constant 5.000000e-01 : f32
    %314 = vector.broadcast %cst_145 : f32 to vector<8x64xf32>
    %315 = arith.mulf %314, %313 : vector<8x64xf32>
    %316 = arith.mulf %303, %315 : vector<8x64xf32>
    %317 = arith.truncf %316 : vector<8x64xf32> to vector<8x64xbf16>
    %c1_146 = arith.constant 1 : index
    %c0_147 = arith.constant 0 : index
    %c0_148 = arith.constant 0 : index
    %318 = vector.load %arg15[%c1_146, %c0_147, %c0_148] : memref<2x64x32xbf16, #tpu.memory_space<vmem>>, vector<1x64x32xbf16>
    %319 = vector.shape_cast %318 : vector<1x64x32xbf16> to vector<64x32xbf16>
    %cst_149 = arith.constant dense<0.000000e+00> : vector<8x32xf32>
    %320 = tpu.matmul %317, %319, %cst_149 {dimension_numbers = #tpu.dot_dimension_numbers<[1], [0], [0], [1], [0, 0, 1, 1], [], []>} : vector<8x64xbf16>, vector<64x32xbf16>, vector<8x32xf32> -> vector<8x32xf32>
    %321 = arith.addf %271, %320 : vector<8x32xf32>
    %c1_150 = arith.constant 1 : index
    %c0_151 = arith.constant 0 : index
    %c0_152 = arith.constant 0 : index
    %322 = vector.load %arg16[%c1_150, %c0_151, %c0_152] : memref<2x1x32xf32, #tpu.memory_space<vmem>>, vector<1x1x32xf32>
    %323 = vector.shape_cast %322 : vector<1x1x32xf32> to vector<1x32xf32>
    %324 = vector.broadcast %323 : vector<1x32xf32> to vector<8x32xf32>
    %325 = arith.addf %321, %324 : vector<8x32xf32>
    %c0_153 = arith.constant 0 : index
    %c0_154 = arith.constant 0 : index
    %326 = vector.load %arg17[%c0_153, %c0_154] : memref<1x32xf32, #tpu.memory_space<vmem>>, vector<1x32xf32>
    %c0_155 = arith.constant 0 : index
    %c0_156 = arith.constant 0 : index
    %327 = vector.load %arg18[%c0_155, %c0_156] : memref<1x32xf32, #tpu.memory_space<vmem>>, vector<1x32xf32>
    %cst_157 = arith.constant dense<0.000000e+00> : vector<8xf32>
    %328 = vector.multi_reduction <add>, %325, %cst_157 [1] : vector<8x32xf32> to vector<8xf32>
    %329 = vector.shape_cast %328 : vector<8xf32> to vector<8x1xf32>
    %cst_158 = arith.constant 3.200000e+01 : f32
    %330 = vector.broadcast %cst_158 : f32 to vector<8x1xf32>
    %331 = arith.divf %329, %330 : vector<8x1xf32>
    %332 = vector.broadcast %331 : vector<8x1xf32> to vector<8x32xf32>
    %333 = arith.subf %325, %332 : vector<8x32xf32>
    %334 = arith.mulf %333, %333 : vector<8x32xf32>
    %cst_159 = arith.constant dense<0.000000e+00> : vector<8xf32>
    %335 = vector.multi_reduction <add>, %334, %cst_159 [1] : vector<8x32xf32> to vector<8xf32>
    %336 = vector.shape_cast %335 : vector<8xf32> to vector<8x1xf32>
    %cst_160 = arith.constant 3.200000e+01 : f32
    %337 = vector.broadcast %cst_160 : f32 to vector<8x1xf32>
    %338 = arith.divf %336, %337 : vector<8x1xf32>
    %cst_161 = arith.constant 9.99999974E-6 : f32
    %339 = vector.broadcast %cst_161 : f32 to vector<8x1xf32>
    %340 = arith.addf %338, %339 : vector<8x1xf32>
    %341 = math.rsqrt %340 : vector<8x1xf32>
    %342 = vector.broadcast %341 : vector<8x1xf32> to vector<8x32xf32>
    %343 = arith.mulf %333, %342 : vector<8x32xf32>
    %344 = vector.broadcast %326 : vector<1x32xf32> to vector<8x32xf32>
    %345 = arith.mulf %343, %344 : vector<8x32xf32>
    %346 = vector.broadcast %327 : vector<1x32xf32> to vector<8x32xf32>
    %347 = arith.addf %345, %346 : vector<8x32xf32>
    %348 = arith.truncf %347 : vector<8x32xf32> to vector<8x32xbf16>
    %c0_162 = arith.constant 0 : index
    %c0_163 = arith.constant 0 : index
    %349 = vector.load %arg19[%c0_162, %c0_163] : memref<32x256xbf16, #tpu.memory_space<vmem>>, vector<32x256xbf16>
    %cst_164 = arith.constant dense<0.000000e+00> : vector<8x256xf32>
    %350 = tpu.matmul %348, %349, %cst_164 {dimension_numbers = #tpu.dot_dimension_numbers<[1], [0], [0], [1], [0, 0, 1, 1], [], []>} : vector<8x32xbf16>, vector<32x256xbf16>, vector<8x256xf32> -> vector<8x256xf32>
    %c0_165 = arith.constant 0 : index
    %c0_166 = arith.constant 0 : index
    %c0_167 = arith.constant 0 : index
    %351 = vector.load %arg20[%c0_165, %c0_166, %c0_167] : memref<1x8x256xf32, #tpu.memory_space<vmem>>, vector<1x8x256xf32>
    %352 = vector.shape_cast %351 : vector<1x8x256xf32> to vector<8x256xf32>
    %353 = vector.shape_cast %350 : vector<8x256xf32> to vector<1x8x256xf32>
    tpu.vector_store %arg20[%c0_165, %c0_166, %c0_167], %353 {strides = array<i32>} : memref<1x8x256xf32, #tpu.memory_space<vmem>>, vector<1x8x256xf32>,
    return
  }
  func.func @transform_0(%arg0: i32) -> (i32, i32, i32) {
    %c0_i32 = arith.constant 0 : i32
    %c0_i32_0 = arith.constant 0 : i32
    %c0_i32_1 = arith.constant 0 : i32
    return %arg0, %c0_i32, %c0_i32_0 : i32, i32, i32
  }
  func.func @transform_1(%arg0: i32) -> (i32, i32, i32) {
    %c0_i32 = arith.constant 0 : i32
    %c0_i32_0 = arith.constant 0 : i32
    %c0_i32_1 = arith.constant 0 : i32
    return %arg0, %c0_i32, %c0_i32_0 : i32, i32, i32
  }
  func.func @transform_2(%arg0: i32) -> (i32, i32) {
    %c0_i32 = arith.constant 0 : i32
    %c0_i32_0 = arith.constant 0 : i32
    %c0_i32_1 = arith.constant 0 : i32
    return %c0_i32, %c0_i32_0 : i32, i32
  }
  func.func @transform_3(%arg0: i32) -> (i32, i32) {
    %c0_i32 = arith.constant 0 : i32
    %c0_i32_0 = arith.constant 0 : i32
    %c0_i32_1 = arith.constant 0 : i32
    return %c0_i32, %c0_i32_0 : i32, i32
  }
  func.func @transform_4(%arg0: i32) -> (i32, i32, i32) {
    %c0_i32 = arith.constant 0 : i32
    %c0_i32_0 = arith.constant 0 : i32
    %c0_i32_1 = arith.constant 0 : i32
    %c0_i32_2 = arith.constant 0 : i32
    return %c0_i32, %c0_i32_0, %c0_i32_1 : i32, i32, i32
  }
  func.func @transform_5(%arg0: i32) -> (i32, i32, i32) {
    %c0_i32 = arith.constant 0 : i32
    %c0_i32_0 = arith.constant 0 : i32
    %c0_i32_1 = arith.constant 0 : i32
    %c0_i32_2 = arith.constant 0 : i32
    return %c0_i32, %c0_i32_0, %c0_i32_1 : i32, i32, i32
  }
  func.func @transform_6(%arg0: i32) -> (i32, i32, i32) {
    %c0_i32 = arith.constant 0 : i32
    %c0_i32_0 = arith.constant 0 : i32
    %c0_i32_1 = arith.constant 0 : i32
    %c0_i32_2 = arith.constant 0 : i32
    return %c0_i32, %c0_i32_0, %c0_i32_1 : i32, i32, i32
  }
  func.func @transform_7(%arg0: i32) -> (i32, i32, i32) {
    %c0_i32 = arith.constant 0 : i32
    %c0_i32_0 = arith.constant 0 : i32
    %c0_i32_1 = arith.constant 0 : i32
    %c0_i32_2 = arith.constant 0 : i32
    return %c0_i32, %c0_i32_0, %c0_i32_1 : i32, i32, i32
  }
  func.func @transform_8(%arg0: i32) -> (i32, i32, i32) {
    %c0_i32 = arith.constant 0 : i32
    %c0_i32_0 = arith.constant 0 : i32
    %c0_i32_1 = arith.constant 0 : i32
    %c0_i32_2 = arith.constant 0 : i32
    return %c0_i32, %c0_i32_0, %c0_i32_1 : i32, i32, i32
  }
  func.func @transform_9(%arg0: i32) -> (i32, i32, i32) {
    %c0_i32 = arith.constant 0 : i32
    %c0_i32_0 = arith.constant 0 : i32
    %c0_i32_1 = arith.constant 0 : i32
    %c0_i32_2 = arith.constant 0 : i32
    return %c0_i32, %c0_i32_0, %c0_i32_1 : i32, i32, i32
  }
  func.func @transform_10(%arg0: i32) -> (i32, i32, i32) {
    %c0_i32 = arith.constant 0 : i32
    %c0_i32_0 = arith.constant 0 : i32
    %c0_i32_1 = arith.constant 0 : i32
    %c0_i32_2 = arith.constant 0 : i32
    return %c0_i32, %c0_i32_0, %c0_i32_1 : i32, i32, i32
  }
  func.func @transform_11(%arg0: i32) -> (i32, i32, i32) {
    %c0_i32 = arith.constant 0 : i32
    %c0_i32_0 = arith.constant 0 : i32
    %c0_i32_1 = arith.constant 0 : i32
    %c0_i32_2 = arith.constant 0 : i32
    return %c0_i32, %c0_i32_0, %c0_i32_1 : i32, i32, i32
  }
  func.func @transform_12(%arg0: i32) -> (i32, i32, i32) {
    %c0_i32 = arith.constant 0 : i32
    %c0_i32_0 = arith.constant 0 : i32
    %c0_i32_1 = arith.constant 0 : i32
    %c0_i32_2 = arith.constant 0 : i32
    return %c0_i32, %c0_i32_0, %c0_i32_1 : i32, i32, i32
  }
  func.func @transform_13(%arg0: i32) -> (i32, i32, i32) {
    %c0_i32 = arith.constant 0 : i32
    %c0_i32_0 = arith.constant 0 : i32
    %c0_i32_1 = arith.constant 0 : i32
    %c0_i32_2 = arith.constant 0 : i32
    return %c0_i32, %c0_i32_0, %c0_i32_1 : i32, i32, i32
  }
  func.func @transform_14(%arg0: i32) -> (i32, i32, i32) {
    %c0_i32 = arith.constant 0 : i32
    %c0_i32_0 = arith.constant 0 : i32
    %c0_i32_1 = arith.constant 0 : i32
    %c0_i32_2 = arith.constant 0 : i32
    return %c0_i32, %c0_i32_0, %c0_i32_1 : i32, i32, i32
  }
  func.func @transform_15(%arg0: i32) -> (i32, i32, i32) {
    %c0_i32 = arith.constant 0 : i32
    %c0_i32_0 = arith.constant 0 : i32
    %c0_i32_1 = arith.constant 0 : i32
    %c0_i32_2 = arith.constant 0 : i32
    return %c0_i32, %c0_i32_0, %c0_i32_1 : i32, i32, i32
  }
  func.func @transform_16(%arg0: i32) -> (i32, i32) {
    %c0_i32 = arith.constant 0 : i32
    %c0_i32_0 = arith.constant 0 : i32
    %c0_i32_1 = arith.constant 0 : i32
    return %c0_i32, %c0_i32_0 : i32, i32
  }
  func.func @transform_17(%arg0: i32) -> (i32, i32) {
    %c0_i32 = arith.constant 0 : i32
    %c0_i32_0 = arith.constant 0 : i32
    %c0_i32_1 = arith.constant 0 : i32
    return %c0_i32, %c0_i32_0 : i32, i32
  }
  func.func @transform_18(%arg0: i32) -> (i32, i32) {
    %c0_i32 = arith.constant 0 : i32
    %c0_i32_0 = arith.constant 0 : i32
    %c0_i32_1 = arith.constant 0 : i32
    return %c0_i32, %c0_i32_0 : i32, i32
  }
  func.func @transform_19(%arg0: i32) -> (i32, i32, i32) {
    %c0_i32 = arith.constant 0 : i32
    %c0_i32_0 = arith.constant 0 : i32
    %c0_i32_1 = arith.constant 0 : i32
    return %arg0, %c0_i32, %c0_i32_0 : i32, i32, i32
  }
  func.func @transform_20(%arg0: i32) -> (i32, i32, i32) {
    %c0_i32 = arith.constant 0 : i32
    %c0_i32_0 = arith.constant 0 : i32
    %c0_i32_1 = arith.constant 0 : i32
    return %arg0, %c0_i32, %c0_i32_0 : i32, i32, i32
  }
}

</mosaic_0001>

<bundles_post_ra>
// kernel: auto_model_merged_forward.1
= control target key start
LH: loop header
LB: loop body
LE: loop exit
PB: predicated region body
PF: predicated region fallthrough
CT: control target
= control target key end

     0   :  { %s3377_s0 = inlined_call_operand.vmem [shape: s32[2,8,1], index: 0, kind: input, shape index: {}]   ;;  %s3378_s1 = inlined_call_operand.vmem [shape: f32[2,1,8], index: 1, kind: input, shape index: {}]   ;;  %s3379_s2 = inlined_call_operand.vmem [shape: f32[256,32], index: 2, kind: input, shape index: {}]   ;;  %s3380_s3 = inlined_call_operand.vmem [shape: f32[8,32], index: 3, kind: input, shape index: {}]   ;;  %s3381_s4 = inlined_call_operand.vmem [shape: f32[2,1,32], index: 4, kind: input, shape index: {}]   ;;  %s3382_s5 = inlined_call_operand.vmem [shape: f32[2,1,32], index: 5, kind: input, shape index: {}]   ;;  %s3383_s6 = inlined_call_operand.vmem [shape: bf16[2,32,96], index: 6, kind: input, shape index: {}]   ;;  %s3384_s7 = inlined_call_operand.vmem [shape: f32[2,1,96], index: 7, kind: input, shape index: {}]   ;;  %s3385_s8 = inlined_call_operand.vmem [shape: bf16[2,32,32], index: 8, kind: input, shape index: {}]   ;;  %s3386_s9 = inlined_call_operand.vmem [shape: f32[2,1,32], index: 9, kind: input, shape index: {}]   ;;  %s3387_s10 = inlined_call_operand.vmem [shape: f32[2,1,32], index: 10, kind: input, shape index: {}]   ;;  %s3388_s11 = inlined_call_operand.vmem [shape: f32[2,1,32], index: 11, kind: input, shape index: {}]   ;;  %s3389_s12 = inlined_call_operand.vmem [shape: bf16[2,32,64], index: 12, kind: input, shape index: {}]   ;;  %s3390_s13 = inlined_call_operand.vmem [shape: f32[2,1,64], index: 13, kind: input, shape index: {}]   ;;  %s3391_s14 = inlined_call_operand.vmem [shape: bf16[2,64,32], index: 14, kind: input, shape index: {}]   ;;  %s3392_s15 = inlined_call_operand.vmem [shape: f32[2,1,32], index: 15, kind: input, shape index: {}]   ;;  %s3393_s16 = inlined_call_operand.vmem [shape: f32[1,32], index: 16, kind: input, shape index: {}]   ;;  %s3394_s17 = inlined_call_operand.vmem [shape: f32[1,32], index: 17, kind: input, shape index: {}]   ;;  %s3395_s18 = inlined_call_operand.vmem [shape: bf16[32,256], index: 18, kind: input, shape index: {}]   ;;  %s3396_s19 = inlined_call_operand.hbm [shape: f32[2,8,256], index: 19, kind: output, shape index: {0}]   ;;  %s3397_s20 = inlined_call_operand.vmem [shape: f32[2,8,128], index: 20, kind: output, shape index: {1}]  }
   0x1   :  { %3411 = sst [smem:[#allocation12_spill]] %s3377_s0 }
   0x2   :  { %3412 = sst [smem:[#allocation13_spill]] %s3378_s1 }
   0x3   :  { %3413 = sst [smem:[#allocation14_spill]] %s3379_s2 }
   0x4   :  { %3414 = sst [smem:[#allocation15_spill]] %s3380_s3 }
   0x5   :  { %3415 = sst [smem:[#allocation16_spill]] %s3381_s4 }
   0x6   :  { %3416 = sst [smem:[#allocation17_spill]] %s3382_s5 }
   0x7   :  { %3417 = sst [smem:[#allocation18_spill]] %s3396_s19 }
   0x8   :  { %26 = vsyncpa [#allocation3], 0 }
   0x9   :  { %28 = vsyncpa [#allocation3 + $0x1], 0  ;;  %s2869_s1 = smov 0   ;;  %s2871_s22 = smov 0  }
   0xa   :  { %s2873_s23 = smov 0   ;;  %s2875_s24 = smov 0  }
   0xb LB: > { %3418 = sst [smem:[#allocation5_spill]] %s2739_s1  ;;  %s2890_s2 = sadd.s32 4294967295, %s2751_s24   ;;  %s2751_s24 = sphi %s2875_s24, %s3443_s24   ;;  %s2747_s23 = sphi %s2873_s23, %s3445_s23   ;;  %s2743_s22 = sphi %s2871_s22, %s3447_s22   ;;  %s2739_s1 = sphi %s2869_s1, %s3446_s1  }
   0xc   : > { %3419 = sst [smem:[#allocation6_spill]] %s2747_s23  ;;  %s2270_s25 = sadd.s32 4294967294, %s2751_s24  }
   0xd   : > { %3420 = sst [smem:[#allocation7_spill]] %s2751_s24  ;;  %s2894_s3 = sadd.s32 1, %s2751_s24  }
   0xe   : > { %3421 = sst [smem:[#allocation8_spill]] %s2894_s3  ;;  %s450_s26 = sadd.s32 1, %s2747_s23 }
   0xf   : > { %s447_s27 = ssub.s32 %s2751_s24, %s2894_s3  ;;  %p460_p0 = scmp.ne.s32.totalorder %s2747_s23, %s2743_s22 }
  0x10   : > { %p448_p1 = scmp.eq.s32.totalorder %s447_s27, 0  ;;  %p461_p2 = scmp.eq.s32.totalorder %s2890_s2, 1 }
  0x11   : > { %p466_p3 = scmp.ne.s32.totalorder %s2743_s22, %s2739_s1  ;;  %p467_p4 = scmp.eq.s32.totalorder %s2270_s25, 1 }
  0x12   : > { %s2905_s28 = scalar_select %p448_p1, %s2747_s23, %s450_s26  }
  0x13   : > { %p2907_p5 = por %p461_p2, %p460_p0  ;;  %p2911_p6 = por %p467_p4, %p466_p3 }
  0x14   : > { %3422 = sst [smem:[#allocation9_spill]] %s2905_s28  ;;  %p2273_p7 = scmp.ge.s32.totalorder %s2751_s24, 1 }
  0x15   : > { %s3423_s4 = scalar_select %p2907_p5, 1, 0 }
  0x16   : > { %s3425_s29 = scalar_select %p2911_p6, 1, 0 }
  0x17   : > { %3424 = sst [smem:[#allocation10_spill]] %s3423_s4  ;;  %p575_p8 = scmp.lt.s32.totalorder %s2751_s24, 3 }
  0x18   : > { %3426 = sst [smem:[#allocation11_spill]] %s3425_s29 }
  0x19   : > { %p576_p9 = pnand %p2273_p7, %p575_p8 }
  0x1a   : > { %p639_p10 = scmp.lt.s32.totalorder (!%p576_p9), %s2890_s2, 1  ;;  %s3427_s21 = sld [smem:[#allocation14_spill]] (!%p576_p9) }
  0x1b   : > { %579 = sbr.rel (%p576_p9) target bundleno = 5476 (0x1564), region = 96  ;;  %s3428_s24 = sld [smem:[#allocation12_spill]] (!%p576_p9) }
  0x1c   : > { %s3429_s4 = sld [smem:[#allocation15_spill]] (!%p576_p9)  ;;  %s2758_s3 = smov (!%p576_p9), 96  }
  0x1d   : > { %s3430_s1 = sld [smem:[#allocation16_spill]] (!%p576_p9)  ;;  %s2759_s30 = smov (!%p576_p9), 80  }
  0x1e   : > { %s3432_s5 = sld [smem:[#allocation17_spill]] (!%p576_p9) }
  0x1f   : > { %s3439_s28 = sld [smem:[#allocation18_spill]] (!%p576_p9) }
  0x20   : > { %v695_v0 = vld [vmem:[%s3427_s21 + $0xf8] sm:$0xff]  ;;  %v694_v2 = vld [vmem:[%s3427_s21 + $0xf0] sm:$0xff]  ;;  %v2753_v3 = vmov 0   ;;  %s2932_s29 = scalar_select %p639_p10, %s2890_s2, 1  ;;  %v693_v5 = vld [vmem:[%s3427_s21 + $0xe8] sm:$0xff]  ;;  %v652_v34 = vlaneseq  ;;  %v2754_v38 = vmov 1.0  }
  0x21   : > { %v679_v1 = vld [vmem:[%s3427_s21 + $0x78] sm:$0xff]  ;;  %2634 = vset.pattern.permute.xlu0 %v2753_v3  ;;  %2376 = vmatprep.subr.mxu0 %v695_v0  ;;  %v678_v4 = vld [vmem:[%s3427_s21 + $0x70] sm:$0xff]  ;;  %v677_v6 = vld [vmem:[%s3427_s21 + $0x68] sm:$0xff]  ;;  %vm781_vm2 = vcmask 261120   ;;  %v2755_v51 = vmov 0.0   ;;  %vm2756_vm3 = vmmov 0  }
  0x22   : > { %2377 = vmatpush3.msra.mxu0 %v679_v1  ;;  %s3409_s26 = sshll.u32 %s2932_s29, 3  ;;  %v692_v7 = vld [vmem:[%s3427_s21 + $0xe0] sm:$0xff]  ;;  %v691_v10 = vld [vmem:[%s3427_s21 + $0xd8] sm:$0xff]  ;;  %v690_v12 = vld [vmem:[%s3427_s21 + $0xd0] sm:$0xff]  ;;  %v3025_v35 = vand.u32 127, %v652_v34  ;;  %2457 = vmatprep.subr.bf16.mxu1 %v2755_v51  ;;  %vm889_vm4 = vcmask 130048  }
  0x23   : > { %2378 = vmatprep.subr.mxu0 %v694_v2  ;;  %s642_s19 = scalar_lea.vmem %s3428_s24, %s3409_s26  ;;  %v676_v8 = vld [vmem:[%s3427_s21 + $0x60] sm:$0xff]  ;;  %v675_v11 = vld [vmem:[%s3427_s21 + $0x58] sm:$0xff]  ;;  %v674_v13 = vld [vmem:[%s3427_s21 + $0x50] sm:$0xff]  ;;  %2461 = vmatprep.mubr.msk.bf16.mxu1 %vm2756_vm3, %v2755_v51  ;;  %s3431_s25 = smov %s3430_s1  ;;  %vm953_vm5 = vcmask 1043456   ;;  %vm937_vm10 = vcmask 64512   ;;  %vm881_vm11 = vcmask 523264  }
  0x24   : > { %2379 = vmatpush3.msra.mxu0 %v678_v4  ;;  %v651_v9 = vld [vmem:[%s642_s19] sm:$0xff]  ;;  %v689_v14 = vld [vmem:[%s3427_s21 + $0xc8] sm:$0xff]  ;;  %v687_v18 = vld [vmem:[%s3427_s21 + $0xb8] sm:$0xff]  ;;  %v654_v36 = vadd.s32 128, %v3025_v35  ;;  %s2757_s19 = smov 64   ;;  %s2760_s24 = smov 112  }
  0x25   : > { %2380 = vmatprep.subr.mxu0 %v693_v5  ;;  %656 = vperm.xlu0 %2634, %v651_v9   ;;  %v673_v15 = vld [vmem:[%s3427_s21 + $0x48] sm:$0xff]  ;;  %v688_v16 = vld [vmem:[%s3427_s21 + $0xc0] sm:$0xff]  ;;  %v671_v19 = vld [vmem:[%s3427_s21 + $0x38] sm:$0xff]  ;;  %s3437_s0 = sshll.u32 %s2932_s29, 3  ;;  %vm1518_vm12 = vcmask 1048064  }
  0x26   : > { %2381 = vmatpush3.msra.mxu0 %v677_v6  ;;  %v672_v17 = vld [vmem:[%s3427_s21 + $0x40] sm:$0xff]  ;;  %v686_v20 = vld [vmem:[%s3427_s21 + $0xb0] sm:$0xff]  ;;  %v685_v22 = vld [vmem:[%s3427_s21 + $0xa8] sm:$0xff] }
  0x27   : > { %2382 = vmatprep.subr.mxu0 %v692_v7  ;;  %v670_v21 = vld [vmem:[%s3427_s21 + $0x30] sm:$0xff]  ;;  %v669_v23 = vld [vmem:[%s3427_s21 + $0x28] sm:$0xff]  ;;  %v684_v24 = vld [vmem:[%s3427_s21 + $0xa0] sm:$0xff] }
  0x28   : > { %2383 = vmatpush3.msra.mxu0 %v676_v8  ;;  %v668_v25 = vld [vmem:[%s3427_s21 + $0x20] sm:$0xff]  ;;  %v683_v26 = vld [vmem:[%s3427_s21 + $0x98] sm:$0xff]  ;;  %v682_v28 = vld [vmem:[%s3427_s21 + $0x90] sm:$0xff] }
  0x29   : > { %2384 = vmatprep.subr.mxu0 %v691_v10  ;;  %v667_v27 = vld [vmem:[%s3427_s21 + $0x18] sm:$0xff]  ;;  %v666_v29 = vld [vmem:[%s3427_s21 + $0x10] sm:$0xff]  ;;  %v681_v30 = vld [vmem:[%s3427_s21 + $0x88] sm:$0xff] }
  0x2a   : > { %2385 = vmatpush3.msra.mxu0 %v675_v11  ;;  %v665_v31 = vld [vmem:[%s3427_s21 + $0x8] sm:$0xff]  ;;  %v680_v32 = vld [vmem:[%s3427_s21 + $0x80] sm:$0xff] }
  0x2b   : > { %2386 = vmatprep.subr.mxu0 %v690_v12  ;;  %v664_v33 = vld [vmem:[%s3427_s21] sm:$0xff]  ;;  %v2635_v50 = vld [vmem:[%s3383_s6 + $0x8] sm:$0xff]  }
  0x2c   : > { %2387 = vmatpush3.msra.mxu0 %v674_v13  ;;  %v696_v40 = vld [vmem:[%s3429_s4] sm:$0xff]  ;;  %2458 = vmatpush3.bf16.msra.mxu1 %v2635_v50  ;;  %s3410_s4 = smov 48  }
  0x2d   : > { %2388 = vmatprep.subr.mxu0 %v689_v14  ;;  %v2636_v52 = vld [vmem:[%s3383_s6] sm:$0xff]   ;;  %2459 = vmatprep.subr.bf16.mxu1 %v2755_v51  ;;  %v768_v14 = vshrl.u32 %v652_v34, 7 }
  0x2e   : > { %2389 = vmatpush3.msra.mxu0 %v673_v15  ;;  %v2281_v57 = vld [vmem:[%s3430_s1] ss:$0 sm:$0xff]  ;;  %s3433_s1 = sld [smem:[#allocation13_spill]] }
  0x2f   : > { %2390 = vmatprep.subr.mxu0 %v688_v16  ;;  %v2282_v59 = vld [vmem:[%s3432_s5] ss:$0 sm:$0xff]  ;;  %v775_v15 = vsub.s32 0, %v768_v14  ;;  %vm769_vm7 = vcmp.le.s32.totalorder %v3025_v35, %v768_v14 }
  0x30   : > { %2391 = vmatpush3.msra.mxu0 %v672_v17  ;;  %2460 = vmatpush3.bf16.msra.mxu1 %v2636_v52  ;;  %v2283_v63 = vld [vmem:[%s3384_s7] ss:$0 sm:$0xff] }
  0x31   : > { %2392 = vmatprep.subr.mxu0 %v687_v18  ;;  %2465 = vmatprep.subr.bf16.mxu1 %v2755_v51 }
  0x32   : > { %2393 = vmatpush3.msra.mxu0 %v671_v19 }
  0x33   : > { %2394 = vmatprep.subr.mxu0 %v686_v20 }
  0x34   : > { %2395 = vmatpush3.msra.mxu0 %v670_v21  ;;  %s645_s27 = scalar_lea.vmem %s3433_s1, %s2932_s29  ;;  %s630_s29 = sand.u32 1, %s2743_s22  }
  0x35   : > { %2396 = vmatprep.subr.mxu0 %v685_v22  ;;  %v770_v13 = vld [vmem:[%s645_s27] sm:$0x1]  ;;  %s2274_s27 = sshll.u32 %s630_s29, 4 }
  0x36   : > { %2397 = vmatpush3.msra.mxu0 %v669_v23  ;;  %vm771_vm6 = vcmp.gt.f32.partialorder %v770_v13, 0.5  ;;  %s632_s26 = scalar_lea.vmem [#allocation2], %s2274_s27 }
  0x37   : > { %2398 = vmatprep.subr.mxu0 %v684_v24  ;;  %v772_v16 = vsel %vm771_vm6, 1, %v2753_v3 }
  0x38   : > { %2399 = vmatpush3.msra.mxu0 %v668_v25  ;;  %v776_v17 = vrot.slane %v772_v16, %v775_v15 }
  0x39   : > { %2400 = vmatprep.subr.mxu0 %v683_v26 }
  0x3a   : > { %2401 = vmatpush3.msra.mxu0 %v667_v27  ;;  %vm777_vm8 = vcmp.eq.s32.totalorder %v776_v17, 1 }
  0x3b   : > { %2402 = vmatprep.subr.mxu0 %v682_v28  ;;  %vm3086_vm9 = vmand %vm769_vm7, %vm777_vm8 }
  0x3c   : > { %2403 = vmatpush3.msra.mxu0 %v666_v29 }
  0x3d   : > { %2404 = vmatprep.subr.mxu0 %v681_v30 }
  0x3e   : > { %2405 = vmatpush3.msra.mxu0 %v665_v31 }
  0x3f   : > { %2406 = vmatprep.subr.mxu0 %v680_v32 }
  0x40   : > { %2407 = vmatpush3.msra.mxu0 %v664_v33 }
  0x41   : > { %2483 = vmatprep.subr.bf16.mxu0 %v2755_v51 }
  0xa0   : > { %v657_v37 = vpop.permute.xlu0 %656 }
  0xa1   : > { %vm658_vm0 = vcmp.eq.s32.totalorder %v657_v37, %v3025_v35  ;;  %vm659_vm1 = vcmp.eq.s32.totalorder %v657_v37, %v654_v36 }
  0xa2   : > { %2279 = vmatprep.mubr.msk.f32.mxu0 %vm659_vm1, %v2754_v38 }
  0xa3   : > { %2280 = vmatmul.mubr.msk.f32.vlgmr.msra.gmra.mxu0 %vm658_vm0, %v2754_v38 }
  0xa4   : > { %2485 = vmatprep.mubr.msk.bf16.mxu0 %vm2756_vm3, %v2755_v51 }
 0x163   : > { %v2408_v39 = vpop.f32.mrf.mxu0 }
 0x165   : > { %v2409_v41 = vpop.f32.mrf.mxu0 }
 0x166   : > { %v2410_v42 = vadd.f32 %v2409_v41, %v2408_v39 }
 0x168   : > { %v3032_v43 = vadd.f32 %v2410_v42, %v696_v40 }
 0x16a   : > { %v782_v44 = vsel %vm781_vm2, %v3032_v43, 0.0 }
 0x16b   : > { %783 = vadd.xlane.f32.xlu0 %v782_v44 }
 0x1f4   : > { %v784_v45 = vpop.xlane.xlu0 %783 }
 0x1f5   : > { %v786_v46 = vmul.f32 0.03125, %v784_v45 }
 0x1f7   : > { %v787_v47 = vsub.f32 %v3032_v43, %v786_v46 }
 0x1f9   : > { %v788_v48 = vmul.f32 %v787_v47, %v787_v47 }
 0x1fb   : > { %v789_v49 = vsel %vm781_vm2, %v788_v48, 0.0 }
 0x1fc   : > { %790 = vadd.xlane.f32.xlu1 %v789_v49 }
 0x285   : > { %v791_v53 = vpop.xlane.xlu1 %790 }
 0x286   : > { %v792_v54 = vmul.f32 0.03125, %v791_v53  ;;  %v2637_v53 = vld [vmem:[%s3385_s8] sm:$0xff]  }
 0x288   : > { %v793_v55 = vadd.f32 1e-05, %v792_v54 }
 0x28a   : > { %2661 = vrsqrt.f32 %v793_v55 }
 0x297   : > { %v2662_v56 = vpop.eup %2661 }
 0x298   : > { %v795_v58 = vmul.f32 %v2662_v56, %v787_v47 }
 0x29a   : > { %v802_v60 = vmul.f32 %v2281_v57, %v795_v58 }
 0x29c   : > { %v809_v61 = vadd.f32 %v2282_v59, %v802_v60  ;;  %v2638_v59 = vld [vmem:[%s3385_s8 + $0x8] sm:$0xff]  }
 0x29e   : > { %v810_v62 = vpack.c.bf16 %v809_v61, %v809_v61 }
 0x2a0   : > { %2462 = vmatmul.mubr.msk.bf16.vlgmr.msra.gmra.mxu1 %vm781_vm2, %v810_v62 }
 0x2a1   : > { %2467 = vmatprep.mubr.msk.bf16.mxu1 %vm2756_vm3, %v2755_v51 }
 0x360   : > { %v871_v0 = vpop.f32.mrf.mxu1 }
 0x361   : > { %v3064_v1 = vadd.f32 %v2283_v63, %v871_v0 }
 0x362   : > { %v2463_v2 = vpop.f32.mrf.mxu1 }
 0x363   : > { %v885_v4 = vpack.c.bf16 %v3064_v1, %v3064_v1  ;;  %v883_v9 = vmul.f32 0.25, %v3064_v1 }
 0x364   : > { %v874_v5 = vpop.f32.mrf.mxu1 }
 0x365   : > { %948 = vrot.lane.b32.xlu0 %v885_v4, %s2757_s19  ;;  %887 = vrot.lane.b32.xlu1 %v885_v4, %s2758_s3  ;;  %v884_v11 = vpack.c.bf16 %v883_v9, %v883_v9 }
 0x366   : > { %v2464_v6 = vpop.f32.mrf.mxu1 }
 0x369   : > { %1005 = vrot.lane.b32.xlu0 %v885_v4, %s2759_s30 }
 0x3d7   : > { %v888_v7 = vpop.permute.xlu1 %887  ;;  %v949_v10 = vpop.permute.xlu0 %948 }
 0x3d8   : > { %v894_v8 = vsel %vm889_vm4, %v888_v7, 0  ;;  %v955_v12 = vsel %vm953_vm5, %v949_v10, 0 }
 0x3d9   : > { %2466 = vmatpush3.bf16.xpose.msra.mxu1 %v894_v8 }
 0x3da   : > { %2471 = vmatprep.subr.bf16.mxu1 %v2755_v51 }
 0x3db   : > { %v1006_v32 = vpop.permute.xlu0 %1005 }
 0x3dc   : > { %v1011_v35 = vsel %vm889_vm4, %v1006_v32, 0  ;;  %v2297_v32 = vld [vmem:[%s3388_s11] ss:$0 sm:$0xff] }
 0x3e0   : > { %2468 = vmatmul.mubr.msk.bf16.vlgmr.msra.gmra.mxu1 %vm889_vm4, %v884_v11 }
 0x3e1   : > { %2472 = vmatpush3.bf16.msra.mxu1 %v955_v12  ;;  %2473 = vmatprep.mubr.msk.bf16.mxu1 %vm2756_vm3, %v2755_v51  ;;  %v2295_v12 = vld [vmem:[%s3386_s9] ss:$0 sm:$0xff] }
 0x3e2   : > { %2477 = vmatprep.subr.bf16.mxu1 %v2755_v51 }
 0x4a0   : > { %v930_v19 = vpop.f32.mrf.mxu1 }
 0x4a1   : > { %v936_v20 = vsel %vm3086_vm9, %v930_v19, -1e+09 }
 0x4a2   : > { %v2469_v21 = vpop.f32.mrf.mxu1  ;;  %v938_v22 = vsel %vm937_vm10, %v936_v20, -inf }
 0x4a3   : > { %939 = vmax.xlane.f32.xlu1 %v938_v22 }
 0x4a4   : > { %v933_v23 = vpop.f32.mrf.mxu1 }
 0x4a6   : > { %v2470_v24 = vpop.f32.mrf.mxu1 }
 0x4b4   : > { %1003 = vrot.lane.b32.xlu1 %v884_v11, %s2760_s24 }
 0x4b8   : > { %1064 = vrot.lane.b32.xlu1 %v885_v4, %s3410_s4  ;;  %s2375_s4 = sshll.u32 %s2890_s2, 8  ;;  %s2763_s2 = smov [#allocation2]  }
 0x4b9   : > { %s3338_s1 = scalar_lea.hbm %s3439_s28, %s2375_s4  ;;  %s2695_s27 = sshll.u32 %s2763_s2, 4  ;;  %s2696_s27 = int_to_ptr.vmem [resolvable:$false] %s2695_s27 }
 0x52c   : > { %v940_v25 = vpop.xlane.xlu1 %939 }
 0x52d   : > { %v941_v26 = vsub.f32 %v936_v20, %v940_v25  ;;  %v2640_v25 = vld [vmem:[%s3389_s12] sm:$0xff]  }
 0x52f   : > { %v942_v27 = vmul.f32 1.442695, %v941_v26 }
 0x530   : > { %v1004_v28 = vpop.permute.xlu1 %1003 }
 0x531   : > { %2663 = vpow2.f32 %v942_v27 }
 0x534   : > { %v1065_v29 = vpop.permute.xlu1 %1064 }
 0x535   : > { %v1070_v30 = vsel %vm953_vm5, %v1065_v29, 0 }
 0x536   : > { %2484 = vmatpush3.bf16.msra.mxu0 %v1070_v30  ;;  %v2296_v30 = vld [vmem:[%s3387_s10] ss:$0 sm:$0xff] }
 0x537   : > { %2495 = vmatprep.subr.bf16.mxu0 %v2755_v51 }
 0x53e   : > { %v2664_v31 = vpop.eup %2663 }
 0x53f   : > { %v944_v33 = vsel %vm937_vm10, %v2664_v31, 0.0  ;;  %v947_v34 = vpack.c.bf16 %v2664_v31, %v2664_v31 }
 0x540   : > { %945 = vadd.xlane.f32.xlu1 %v944_v33 }
 0x541   : > { %2474 = vmatmul.mubr.msk.bf16.vlgmr.msra.gmra.mxu1 %vm937_vm10, %v947_v34 }
 0x542   : > { %2478 = vmatpush3.bf16.xpose.msra.mxu1 %v1011_v35  ;;  %2479 = vmatprep.mubr.msk.bf16.mxu1 %vm2756_vm3, %v2755_v51 }
 0x543   : > { %2489 = vmatprep.subr.bf16.mxu1 %v2755_v51 }
 0x549   : > { %2480 = vmatmul.mubr.msk.bf16.vlgmr.msra.gmra.mxu1 %vm889_vm4, %v1004_v28 }
 0x54a   : > { %2491 = vmatprep.mubr.msk.bf16.mxu1 %vm2756_vm3, %v2755_v51  ;;  %2490 = vmatpush3.bf16.msra.mxu1 %v2638_v59  ;;  %v2307_v59 = vld [vmem:[%s3392_s15] ss:$0 sm:$0xff] }
 0x54b   : > { %2501 = vmatprep.subr.bf16.mxu1 %v2755_v51 }
 0x5c9   : > { %v946_v50 = vpop.xlane.xlu1 %945 }
 0x601   : > { %v991_v36 = vpop.f32.mrf.mxu1 }
 0x603   : > { %v2475_v37 = vpop.f32.mrf.mxu1 }
 0x604   : > { %v2642_v37 = vld [vmem:[%s3391_s14 + $0x10] sm:$0xff]  }
 0x605   : > { %v994_v38 = vpop.f32.mrf.mxu1 }
 0x606   : > { %v2643_v38 = vld [vmem:[%s3391_s14 + $0x8] sm:$0xff]  }
 0x607   : > { %v2476_v39 = vpop.f32.mrf.mxu1 }
 0x608   : > { %v2644_v39 = vld [vmem:[%s3391_s14] sm:$0xff]  }
 0x609   : > { %v1047_v40 = vpop.f32.mrf.mxu1 }
 0x60a   : > { %v1053_v41 = vsel %vm3086_vm9, %v1047_v40, -1e+09  ;;  %v2298_v40 = vld [vmem:[%s3390_s13] ss:$0 sm:$0xff] }
 0x60b   : > { %v2481_v42 = vpop.f32.mrf.mxu1  ;;  %v1054_v44 = vsel %vm937_vm10, %v1053_v41, -inf }
 0x60c   : > { %1055 = vmax.xlane.f32.xlu0 %v1054_v44 }
 0x60d   : > { %v1050_v45 = vpop.f32.mrf.mxu1 }
 0x60f   : > { %v2482_v46 = vpop.f32.mrf.mxu1 }
 0x695   : > { %v1056_v47 = vpop.xlane.xlu0 %1055 }
 0x696   : > { %v1057_v48 = vsub.f32 %v1053_v41, %v1056_v47 }
 0x698   : > { %v1058_v49 = vmul.f32 1.442695, %v1057_v48 }
 0x69a   : > { %2665 = vpow2.f32 %v1058_v49 }
 0x69b   : > { %2667 = vrcp.f32 %v946_v50 }
 0x6a7   : > { %v2666_v52 = vpop.eup %2665 }
 0x6a8   : > { %v1060_v54 = vsel %vm937_vm10, %v2666_v52, 0.0  ;;  %v1063_v55 = vpack.c.bf16 %v2666_v52, %v2666_v52  ;;  %v2668_v56 = vpop.eup %2667 }
 0x6a9   : > { %1061 = vadd.xlane.f32.xlu0 %v1060_v54  ;;  %v998_v57 = vmul.f32 %v2668_v56, %v991_v36  ;;  %v2641_v36 = vld [vmem:[%s3391_s14 + $0x18] sm:$0xff]  }
 0x6aa   : > { %2486 = vmatmul.mubr.msk.bf16.vlgmr.msra.gmra.mxu0 %vm937_vm10, %v1063_v55 }
 0x6ab   : > { %2496 = vmatpush3.bf16.msra.mxu0 %v2637_v53  ;;  %2497 = vmatprep.mubr.msk.bf16.mxu0 %vm2756_vm3, %v2755_v51  ;;  %v999_v58 = vpack.c.bf16 %v998_v57, %v998_v57 }
 0x6ac   : > { %2509 = vmatprep.subr.bf16.mxu0 %v2755_v51 }
 0x6b2   : > { %2498 = vmatmul.mubr.msk.bf16.vlgmr.msra.gmra.mxu0 %vm889_vm4, %v999_v58 }
 0x6b3   : > { %2517 = vmatprep.mubr.msk.bf16.mxu0 %vm2756_vm3, %v2755_v51  ;;  %2510 = vmatpush3.bf16.msra.mxu0 %v2641_v36 }
 0x6b4   : > { %2511 = vmatprep.subr.bf16.mxu0 %v2755_v51 }
 0x6b7   : > { %2512 = vmatpush3.bf16.msra.mxu0 %v2642_v37 }
 0x6b8   : > { %2513 = vmatprep.subr.bf16.mxu0 %v2755_v51 }
 0x6bb   : > { %2514 = vmatpush3.bf16.msra.mxu0 %v2643_v38 }
 0x6bc   : > { %2515 = vmatprep.subr.bf16.mxu0 %v2755_v51 }
 0x6bf   : > { %2516 = vmatpush3.bf16.msra.mxu0 %v2644_v39 }
 0x6c0   : > { %2535 = vmatprep.subr.bf16.mxu0 %v2755_v51 }
 0x732   : > { %v1062_v60 = vpop.xlane.xlu0 %1061 }
 0x733   : > { %2669 = vrcp.f32 %v1062_v60 }
 0x740   : > { %v2670_v61 = vpop.eup %2669 }
 0x76a   : > { %v1106_v62 = vpop.f32.mrf.mxu0 }
 0x76b   : > { %v1113_v63 = vmul.f32 %v2670_v61, %v1106_v62 }
 0x76c   : > { %v2487_v0 = vpop.f32.mrf.mxu0 }
 0x76d   : > { %v1114_v2 = vpack.c.bf16 %v1113_v63, %v1113_v63 }
 0x76e   : > { %v1109_v4 = vpop.f32.mrf.mxu0 }
 0x76f   : > { %2492 = vmatmul.mubr.msk.bf16.vlgmr.msra.gmra.mxu1 %vm889_vm4, %v1114_v2 }
 0x770   : > { %v2488_v5 = vpop.f32.mrf.mxu0  ;;  %2505 = vmatprep.mubr.msk.bf16.mxu1 %vm2756_vm3, %v2755_v51 }
 0x772   : > { %v1209_v6 = vpop.f32.mrf.mxu0 }
 0x774   : > { %v2499_v7 = vpop.f32.mrf.mxu0 }
 0x776   : > { %v1212_v8 = vpop.f32.mrf.mxu0 }
 0x778   : > { %v2500_v9 = vpop.f32.mrf.mxu0 }
 0x779   : > { %v2645_v9 = vld [vmem:[%s3383_s6 + $0x18] sm:$0xff]  }
 0x82f   : > { %v1160_v10 = vpop.f32.mrf.mxu1 }
 0x830   : > { %v1210_v11 = vadd.f32 %v1209_v6, %v1160_v10  ;;  %v2646_v10 = vld [vmem:[%s3383_s6 + $0x10] sm:$0xff]  }
 0x831   : > { %v2493_v13 = vpop.f32.mrf.mxu1 }
 0x832   : > { %v1215_v14 = vadd.f32 %v1210_v11, %v3032_v43  ;;  %v2639_v43 = vld [vmem:[%s3389_s12 + $0x8] sm:$0xff]  }
 0x833   : > { %v1163_v15 = vpop.f32.mrf.mxu1  ;;  %2502 = vmatpush3.bf16.msra.mxu1 %v2639_v43 }
 0x834   : > { %v3131_v16 = vadd.f32 %v2295_v12, %v1215_v14  ;;  %2503 = vmatprep.subr.bf16.mxu1 %v2755_v51  ;;  %v2310_v15 = vld [vmem:[%s3431_s25 + $0x1] ss:$0 sm:$0xff] }
 0x835   : > { %v2494_v17 = vpop.f32.mrf.mxu1 }
 0x836   : > { %v1226_v19 = vsel %vm781_vm2, %v3131_v16, 0.0  ;;  %v2311_v17 = vld [vmem:[%s3432_s5 + $0x1] ss:$0 sm:$0xff]  ;;  %s2697_s5 = scalar_lea.vmem %s2696_s27, 512 }
 0x837   : > { %1227 = vadd.xlane.f32.xlu0 %v1226_v19  ;;  %2504 = vmatpush3.bf16.msra.mxu1 %v2640_v25 }
 0x838   : > { %2521 = vmatprep.subr.bf16.mxu1 %v2755_v51 }
 0x8c0   : > { %v1228_v20 = vpop.xlane.xlu0 %1227 }
 0x8c1   : > { %v1229_v21 = vmul.f32 0.03125, %v1228_v20 }
 0x8c3   : > { %v1230_v22 = vsub.f32 %v3131_v16, %v1229_v21 }
 0x8c5   : > { %v1231_v23 = vmul.f32 %v1230_v22, %v1230_v22 }
 0x8c7   : > { %v1232_v24 = vsel %vm781_vm2, %v1231_v23, 0.0 }
 0x8c8   : > { %1233 = vadd.xlane.f32.xlu0 %v1232_v24 }
 0x951   : > { %v1234_v26 = vpop.xlane.xlu0 %1233 }
 0x952   : > { %v1235_v27 = vmul.f32 0.03125, %v1234_v26 }
 0x954   : > { %v1236_v28 = vadd.f32 1e-05, %v1235_v27 }
 0x956   : > { %2671 = vrsqrt.f32 %v1236_v28 }
 0x963   : > { %v2672_v29 = vpop.eup %2671 }
 0x964   : > { %v1238_v31 = vmul.f32 %v2672_v29, %v1230_v22  ;;  %v2317_v22 = vld [vmem:[%s3384_s7 + $0x1] ss:$0 sm:$0xff] }
 0x966   : > { %v1245_v33 = vmul.f32 %v2296_v30, %v1238_v31 }
 0x968   : > { %v1252_v34 = vadd.f32 %v2297_v32, %v1245_v33 }
 0x96a   : > { %v1253_v35 = vpack.c.bf16 %v1252_v34, %v1252_v34 }
 0x96c   : > { %2506 = vmatmul.mubr.msk.bf16.vlgmr.msra.gmra.mxu1 %vm781_vm2, %v1253_v35 }
 0x96d   : > { %2525 = vmatprep.mubr.msk.bf16.mxu1 %vm2756_vm3, %v2755_v51  ;;  %2522 = vmatpush3.bf16.msra.mxu1 %v2645_v9 }
 0x96e   : > { %2523 = vmatprep.subr.bf16.mxu1 %v2755_v51 }
 0x971   : > { %2524 = vmatpush3.bf16.msra.mxu1 %v2646_v10 }
 0x972   : > { %2529 = vmatprep.subr.bf16.mxu1 %v2755_v51 }
 0xa2c   : > { %v1314_v41 = vpop.f32.mrf.mxu1 }
 0xa2d   : > { %v1315_v42 = vadd.f32 %v2298_v40, %v1314_v41 }
 0xa2e   : > { %v2507_v44 = vpop.f32.mrf.mxu1 }
 0xa2f   : > { %v1320_v45 = vmul.f32 %v1315_v42, %v1315_v42 }
 0xa30   : > { %v1317_v46 = vpop.f32.mrf.mxu1 }
 0xa31   : > { %v1321_v47 = vmul.f32 %v1320_v45, %v1315_v42 }
 0xa32   : > { %v2508_v48 = vpop.f32.mrf.mxu1 }
 0xa33   : > { %v1322_v49 = vmul.f32 0.044715, %v1321_v47 }
 0xa35   : > { %v1323_v50 = vadd.f32 %v1322_v49, %v1315_v42 }
 0xa37   : > { %v1324_v52 = vmul.f32 0.7978846, %v1323_v50 }
 0xa39   : > { %2673 = vtanh.f32 %v1324_v52 }
 0xa46   : > { %v2674_v53 = vpop.eup %2673 }
 0xa47   : > { %v1326_v54 = vadd.f32 1.0, %v2674_v53 }
 0xa49   : > { %v1327_v55 = vmul.f32 0.5, %v1326_v54 }
 0xa4b   : > { %v1328_v56 = vmul.f32 %v1327_v55, %v1315_v42 }
 0xa4d   : > { %v1329_v57 = vpack.c.bf16 %v1328_v56, %v1328_v56 }
 0xa4f   : > { %2518 = vmatmul.mubr.msk.bf16.vlgmr.msra.gmra.mxu0 %vm881_vm11, %v1329_v57 }
 0xa50   : > { %2537 = vmatprep.mubr.msk.bf16.mxu0 %vm2756_vm3, %v2755_v51 }
 0xb0f   : > { %v1399_v58 = vpop.f32.mrf.mxu0 }
 0xb10   : > { %v1405_v60 = vadd.f32 %v1399_v58, %v3131_v16 }
 0xb11   : > { %v2519_v61 = vpop.f32.mrf.mxu0 }
 0xb12   : > { %v3180_v62 = vadd.f32 %v2307_v59, %v1405_v60 }
 0xb13   : > { %v1402_v63 = vpop.f32.mrf.mxu0 }
 0xb14   : > { %v1418_v0 = vsel %vm781_vm2, %v3180_v62, 0.0 }
 0xb15   : > { %1419 = vadd.xlane.f32.xlu0 %v1418_v0  ;;  %v2520_v2 = vpop.f32.mrf.mxu0 }
 0xb16   : > { %v2647_v2 = vld [vmem:[%s3385_s8 + $0x10] sm:$0xff]  }
 0xb9e   : > { %v1420_v4 = vpop.xlane.xlu0 %1419 }
 0xb9f   : > { %v1421_v5 = vmul.f32 0.03125, %v1420_v4  ;;  %v2648_v4 = vld [vmem:[%s3385_s8 + $0x18] sm:$0xff]  }
 0xba1   : > { %v1422_v6 = vsub.f32 %v3180_v62, %v1421_v5 }
 0xba3   : > { %v1423_v7 = vmul.f32 %v1422_v6, %v1422_v6 }
 0xba5   : > { %v1424_v8 = vsel %vm781_vm2, %v1423_v7, 0.0 }
 0xba6   : > { %1425 = vadd.xlane.f32.xlu0 %v1424_v8 }
 0xc2f   : > { %v1426_v11 = vpop.xlane.xlu0 %1425 }
 0xc30   : > { %v1427_v12 = vmul.f32 0.03125, %v1426_v11 }
 0xc32   : > { %v1428_v13 = vadd.f32 1e-05, %v1427_v12 }
 0xc34   : > { %2675 = vrsqrt.f32 %v1428_v13 }
 0xc41   : > { %v2676_v14 = vpop.eup %2675 }
 0xc42   : > { %v1430_v16 = vmul.f32 %v2676_v14, %v1422_v6 }
 0xc44   : > { %v1437_v19 = vmul.f32 %v2310_v15, %v1430_v16 }
 0xc46   : > { %v1444_v20 = vadd.f32 %v2311_v17, %v1437_v19 }
 0xc48   : > { %v1445_v21 = vpack.c.bf16 %v1444_v20, %v1444_v20 }
 0xc4a   : > { %2526 = vmatmul.mubr.msk.bf16.vlgmr.msra.gmra.mxu1 %vm781_vm2, %v1445_v21 }
 0xc4b   : > { %2531 = vmatprep.mubr.msk.bf16.mxu1 %vm2756_vm3, %v2755_v51 }
 0xd0a   : > { %v1508_v23 = vpop.f32.mrf.mxu1 }
 0xd0b   : > { %v3206_v24 = vadd.f32 %v2317_v22, %v1508_v23 }
 0xd0c   : > { %v2527_v43 = vpop.f32.mrf.mxu1 }
 0xd0d   : > { %v1522_v25 = vpack.c.bf16 %v3206_v24, %v3206_v24  ;;  %v1520_v26 = vmul.f32 0.25, %v3206_v24 }
 0xd0e   : > { %v1511_v27 = vpop.f32.mrf.mxu1 }
 0xd0f   : > { %1640 = vrot.lane.b32.xlu1 %v1522_v25, %s2759_s30  ;;  %1524 = vrot.lane.b32.xlu0 %v1522_v25, %s2758_s3  ;;  %v1521_v29 = vpack.c.bf16 %v1520_v26, %v1520_v26  ;;  %s3436_s30 = smov 48  }
 0xd10   : > { %v2528_v28 = vpop.f32.mrf.mxu1 }
 0xd11   : > { %v2334_v28 = vld [vmem:[%s3386_s9 + $0x1] ss:$0 sm:$0xff] }
 0xd13   : > { %1638 = vrot.lane.b32.xlu1 %v1521_v29, %s2760_s24 }
 0xd81   : > { %v1525_v30 = vpop.permute.xlu0 %1524  ;;  %v1641_v32 = vpop.permute.xlu1 %1640 }
 0xd82   : > { %v1530_v31 = vsel %vm889_vm4, %v1525_v30, 0  ;;  %v1646_v33 = vsel %vm889_vm4, %v1641_v32, 0 }
 0xd83   : > { %2530 = vmatpush3.bf16.xpose.msra.mxu1 %v1530_v31 }
 0xd84   : > { %2541 = vmatprep.subr.bf16.mxu1 %v2755_v51 }
 0xd85   : > { %v1639_v34 = vpop.permute.xlu1 %1638 }
 0xd8a   : > { %2532 = vmatmul.mubr.msk.bf16.vlgmr.msra.gmra.mxu1 %vm889_vm4, %v1521_v29 }
 0xd8b   : > { %2542 = vmatpush3.bf16.xpose.msra.mxu1 %v1646_v33  ;;  %2543 = vmatprep.mubr.msk.bf16.mxu1 %vm2756_vm3, %v2755_v51 }
 0xd8c   : > { %2553 = vmatprep.subr.bf16.mxu1 %v2755_v51 }
 0xd92   : > { %2544 = vmatmul.mubr.msk.bf16.vlgmr.msra.gmra.mxu1 %vm889_vm4, %v1639_v34 }
 0xd93   : > { %2555 = vmatprep.mubr.msk.bf16.mxu1 %vm2756_vm3, %v2755_v51  ;;  %2554 = vmatpush3.bf16.msra.mxu1 %v2648_v4 }
 0xd94   : > { %2565 = vmatprep.subr.bf16.mxu1 %v2755_v51 }
 0xe4a   : > { %v1566_v35 = vpop.f32.mrf.mxu1 }
 0xe4b   : > { %v1572_v36 = vsel %vm3086_vm9, %v1566_v35, -1e+09 }
 0xe4c   : > { %v2533_v37 = vpop.f32.mrf.mxu1  ;;  %v1573_v38 = vsel %vm937_vm10, %v1572_v36, -inf }
 0xe4d   : > { %1574 = vmax.xlane.f32.xlu0 %v1573_v38 }
 0xe4e   : > { %v1569_v39 = vpop.f32.mrf.mxu1 }
 0xe50   : > { %v2534_v40 = vpop.f32.mrf.mxu1 }
 0xe51   : > { %v2649_v40 = vld [vmem:[%s3389_s12 + $0x18] sm:$0xff]  }
 0xe52   : > { %v1682_v41 = vpop.f32.mrf.mxu1 }
 0xe53   : > { %v1688_v42 = vsel %vm3086_vm9, %v1682_v41, -1e+09 }
 0xe54   : > { %v2545_v44 = vpop.f32.mrf.mxu1  ;;  %v1689_v45 = vsel %vm937_vm10, %v1688_v42, -inf }
 0xe55   : > { %1690 = vmax.xlane.f32.xlu1 %v1689_v45 }
 0xe56   : > { %v1685_v46 = vpop.f32.mrf.mxu1 }
 0xe57   : > { %v2337_v46 = vld [vmem:[%s3387_s10 + $0x1] ss:$0 sm:$0xff] }
 0xe58   : > { %v2546_v47 = vpop.f32.mrf.mxu1 }
 0xe63   : > { %1583 = vrot.lane.b32.xlu0 %v1522_v25, %s2757_s19  ;;  %s2762_s19 = smov 32  }
 0xe66   : > { %1699 = vrot.lane.b32.xlu1 %v1522_v25, %s3436_s30  ;;  %s649_s30 = scalar_lea.vmem %s3397_s20, %s3437_s0 }
 0xed6   : > { %v1575_v48 = vpop.xlane.xlu0 %1574 }
 0xed7   : > { %v1576_v49 = vsub.f32 %v1572_v36, %v1575_v48  ;;  %v2338_v48 = vld [vmem:[%s3388_s11 + $0x1] ss:$0 sm:$0xff] }
 0xed9   : > { %v1577_v50 = vmul.f32 1.442695, %v1576_v49 }
 0xeda   : > { %v1584_v52 = vpop.permute.xlu0 %1583 }
 0xedb   : > { %2677 = vpow2.f32 %v1577_v50  ;;  %v1589_v53 = vsel %vm953_vm5, %v1584_v52, 0 }
 0xedc   : > { %2536 = vmatpush3.bf16.msra.mxu0 %v1589_v53  ;;  %v2651_v53 = vld [vmem:[%s3391_s14 + $0x38] sm:$0xff]  }
 0xedd   : > { %2547 = vmatprep.subr.bf16.mxu0 %v2755_v51 }
 0xede   : > { %v1691_v18 = vpop.xlane.xlu1 %1690 }
 0xedf   : > { %v1692_v54 = vsub.f32 %v1688_v42, %v1691_v18  ;;  %v2652_v18 = vld [vmem:[%s3391_s14 + $0x30] sm:$0xff]  }
 0xee1   : > { %v1693_v55 = vmul.f32 1.442695, %v1692_v54  ;;  %v2653_v54 = vld [vmem:[%s3391_s14 + $0x28] sm:$0xff]  }
 0xee2   : > { %v1700_v57 = vpop.permute.xlu1 %1699 }
 0xee3   : > { %2679 = vpow2.f32 %v1693_v55  ;;  %v1705_v60 = vsel %vm953_vm5, %v1700_v57, 0  ;;  %v2344_v55 = vld [vmem:[%s3390_s13 + $0x1] ss:$0 sm:$0xff] }
 0xee8   : > { %v2678_v56 = vpop.eup %2677 }
 0xee9   : > { %v1579_v58 = vsel %vm937_vm10, %v2678_v56, 0.0  ;;  %v1582_v59 = vpack.c.bf16 %v2678_v56, %v2678_v56 }
 0xeea   : > { %1580 = vadd.xlane.f32.xlu0 %v1579_v58 }
 0xeeb   : > { %2538 = vmatmul.mubr.msk.bf16.vlgmr.msra.gmra.mxu0 %vm937_vm10, %v1582_v59 }
 0xeec   : > { %2548 = vmatpush3.bf16.msra.mxu0 %v1705_v60  ;;  %2549 = vmatprep.mubr.msk.bf16.mxu0 %vm2756_vm3, %v2755_v51 }
 0xeed   : > { %2559 = vmatprep.subr.bf16.mxu0 %v2755_v51 }
 0xef0   : > { %v2680_v61 = vpop.eup %2679 }
 0xef1   : > { %v1695_v63 = vsel %vm937_vm10, %v2680_v61, 0.0  ;;  %v1698_v0 = vpack.c.bf16 %v2680_v61, %v2680_v61 }
 0xef2   : > { %1696 = vadd.xlane.f32.xlu1 %v1695_v63 }
 0xef3   : > { %2550 = vmatmul.mubr.msk.bf16.vlgmr.msra.gmra.mxu0 %vm937_vm10, %v1698_v0 }
 0xef4   : > { %2561 = vmatprep.mubr.msk.bf16.mxu0 %vm2756_vm3, %v2755_v51  ;;  %2560 = vmatpush3.bf16.msra.mxu0 %v2647_v2 }
 0xef5   : > { %2573 = vmatprep.subr.bf16.mxu0 %v2755_v51 }
 0xf73   : > { %v1581_v5 = vpop.xlane.xlu0 %1580 }
 0xf74   : > { %2681 = vrcp.f32 %v1581_v5 }
 0xf7b   : > { %v1697_v6 = vpop.xlane.xlu1 %1696 }
 0xf7c   : > { %2683 = vrcp.f32 %v1697_v6 }
 0xf81   : > { %v2682_v7 = vpop.eup %2681 }
 0xf89   : > { %v2684_v14 = vpop.eup %2683 }
 0xfab   : > { %v1625_v8 = vpop.f32.mrf.mxu0 }
 0xfac   : > { %v1632_v9 = vmul.f32 %v2682_v7, %v1625_v8 }
 0xfad   : > { %v2539_v10 = vpop.f32.mrf.mxu0 }
 0xfae   : > { %v1633_v11 = vpack.c.bf16 %v1632_v9, %v1632_v9  ;;  %v2362_v10 = vld [vmem:[%s3392_s15 + $0x1] ss:$0 sm:$0xff] }
 0xfaf   : > { %v1628_v12 = vpop.f32.mrf.mxu0 }
 0xfb0   : > { %2562 = vmatmul.mubr.msk.bf16.vlgmr.msra.gmra.mxu0 %vm889_vm4, %v1633_v11 }
 0xfb1   : > { %v2540_v13 = vpop.f32.mrf.mxu0  ;;  %2581 = vmatprep.mubr.msk.bf16.mxu0 %vm2756_vm3, %v2755_v51  ;;  %2574 = vmatpush3.bf16.msra.mxu0 %v2651_v53 }
 0xfb2   : > { %2575 = vmatprep.subr.bf16.mxu0 %v2755_v51 }
 0xfb3   : > { %v1741_v15 = vpop.f32.mrf.mxu0 }
 0xfb4   : > { %v1748_v16 = vmul.f32 %v2684_v14, %v1741_v15 }
 0xfb5   : > { %v2551_v17 = vpop.f32.mrf.mxu0  ;;  %2576 = vmatpush3.bf16.msra.mxu0 %v2652_v18 }
 0xfb6   : > { %v1749_v19 = vpack.c.bf16 %v1748_v16, %v1748_v16  ;;  %2577 = vmatprep.subr.bf16.mxu0 %v2755_v51 }
 0xfb7   : > { %v1744_v20 = vpop.f32.mrf.mxu0 }
 0xfb8   : > { %2556 = vmatmul.mubr.msk.bf16.vlgmr.msra.gmra.mxu1 %vm889_vm4, %v1749_v19 }
 0xfb9   : > { %v2552_v21 = vpop.f32.mrf.mxu0  ;;  %2569 = vmatprep.mubr.msk.bf16.mxu1 %vm2756_vm3, %v2755_v51  ;;  %2566 = vmatpush3.bf16.msra.mxu1 %v2649_v40 }
 0xfba   : > { %2567 = vmatprep.subr.bf16.mxu1 %v2755_v51  ;;  %2578 = vmatpush3.bf16.msra.mxu0 %v2653_v54 }
 0xfbb   : > { %2579 = vmatprep.subr.bf16.mxu0 %v2755_v51 }
0x1070   : > { %v1844_v22 = vpop.f32.mrf.mxu0 }
0x1072   : > { %v2563_v23 = vpop.f32.mrf.mxu0 }
0x1074   : > { %v1847_v43 = vpop.f32.mrf.mxu0 }
0x1075   : > { %v2655_v43 = vld [vmem:[%s3395_s18 + $0x10] ss:$8 sps:$4 sm:$0xff]  }
0x1076   : > { %v2564_v25 = vpop.f32.mrf.mxu0 }
0x1077   : > { %v2660_v25 = vld [vmem:[%s3395_s18 + $0x4] ss:$8 sps:$4 sm:$0xff]  }
0x1078   : > { %v1795_v26 = vpop.f32.mrf.mxu1 }
0x1079   : > { %v1845_v27 = vadd.f32 %v1844_v22, %v1795_v26  ;;  %v2658_v26 = vld [vmem:[%s3395_s18] ss:$8 sps:$4 sm:$0xff]  }
0x107a   : > { %v2557_v29 = vpop.f32.mrf.mxu1 }
0x107b   : > { %v1850_v30 = vadd.f32 %v1845_v27, %v3180_v62  ;;  %v2650_v62 = vld [vmem:[%s3389_s12 + $0x10] sm:$0xff]  }
0x107c   : > { %v1798_v31 = vpop.f32.mrf.mxu1  ;;  %2568 = vmatpush3.bf16.msra.mxu1 %v2650_v62 }
0x107d   : > { %v1859_v32 = vadd.f32 %v2334_v28, %v1850_v30  ;;  %v2363_v31 = vld [vmem:[%s3393_s16] ss:$0 sm:$0xff] }
0x107e   : > { %v2558_v33 = vpop.f32.mrf.mxu1 }
0x107f   : > { %v1864_v34 = vsel %vm781_vm2, %v1859_v32, 0.0  ;;  %v2364_v33 = vld [vmem:[%s3394_s17] ss:$0 sm:$0xff] }
0x1080   : > { %1865 = vadd.xlane.f32.xlu0 %v1864_v34 }
0x1109   : > { %v1866_v35 = vpop.xlane.xlu0 %1865 }
0x110a   : > { %v1867_v36 = vmul.f32 0.03125, %v1866_v35 }
0x110c   : > { %v1868_v37 = vsub.f32 %v1859_v32, %v1867_v36 }
0x110e   : > { %v1869_v38 = vmul.f32 %v1868_v37, %v1868_v37 }
0x1110   : > { %v1870_v39 = vsel %vm781_vm2, %v1869_v38, 0.0 }
0x1111   : > { %1871 = vadd.xlane.f32.xlu0 %v1870_v39 }
0x119a   : > { %v1872_v41 = vpop.xlane.xlu0 %1871 }
0x119b   : > { %v1873_v42 = vmul.f32 0.03125, %v1872_v41 }
0x119d   : > { %v1874_v44 = vadd.f32 1e-05, %v1873_v42 }
0x119f   : > { %2685 = vrsqrt.f32 %v1874_v44 }
0x11ac   : > { %v2686_v45 = vpop.eup %2685 }
0x11ad   : > { %v1876_v47 = vmul.f32 %v2686_v45, %v1868_v37 }
0x11af   : > { %v1883_v49 = vmul.f32 %v2337_v46, %v1876_v47 }
0x11b1   : > { %v1890_v50 = vadd.f32 %v2338_v48, %v1883_v49 }
0x11b3   : > { %v1891_v52 = vpack.c.bf16 %v1890_v50, %v1890_v50 }
0x11b5   : > { %2570 = vmatmul.mubr.msk.bf16.vlgmr.msra.gmra.mxu1 %vm781_vm2, %v1891_v52 }
0x11b6   : > { %2145 = vmatprep.mubr.bf16.mxu1 %v2753_v3  ;;  %v2654_v3 = vld [vmem:[%s3391_s14 + $0x20] sm:$0xff]  }
0x11b7   : > { %2580 = vmatpush3.bf16.msra.mxu0 %v2654_v3 }
0x1275   : > { %v1954_v56 = vpop.f32.mrf.mxu1 }
0x1276   : > { %v1955_v57 = vadd.f32 %v2344_v55, %v1954_v56 }
0x1277   : > { %v2571_v58 = vpop.f32.mrf.mxu1 }
0x1278   : > { %v1960_v59 = vmul.f32 %v1955_v57, %v1955_v57 }
0x1279   : > { %v1957_v60 = vpop.f32.mrf.mxu1 }
0x127a   : > { %v1961_v61 = vmul.f32 %v1960_v59, %v1955_v57 }
0x127b   : > { %v2572_v63 = vpop.f32.mrf.mxu1 }
0x127c   : > { %v1962_v0 = vmul.f32 0.044715, %v1961_v61 }
0x127e   : > { %v1963_v2 = vadd.f32 %v1962_v0, %v1955_v57 }
0x1280   : > { %v1964_v4 = vmul.f32 0.7978846, %v1963_v2 }
0x1282   : > { %2687 = vtanh.f32 %v1964_v4 }
0x128f   : > { %v2688_v51 = vpop.eup %2687 }
0x1290   : > { %v1966_v5 = vadd.f32 1.0, %v2688_v51 }
0x1292   : > { %v1967_v6 = vmul.f32 0.5, %v1966_v5 }
0x1294   : > { %v1968_v7 = vmul.f32 %v1967_v6, %v1955_v57 }
0x1296   : > { %v1969_v8 = vpack.c.bf16 %v1968_v7, %v1968_v7 }
0x1298   : > { %2582 = vmatmul.mubr.msk.bf16.vlgmr.msra.gmra.mxu0 %vm881_vm11, %v1969_v8 }
0x1358   : > { %v2040_v9 = vpop.f32.mrf.mxu0 }
0x1359   : > { %v2046_v11 = vadd.f32 %v2040_v9, %v1859_v32 }
0x135a   : > { %v2583_v12 = vpop.f32.mrf.mxu0 }
0x135b   : > { %v2055_v13 = vadd.f32 %v2362_v10, %v2046_v11 }
0x135c   : > { %v2043_v14 = vpop.f32.mrf.mxu0 }
0x135d   : > { %v2058_v15 = vsel %vm781_vm2, %v2055_v13, 0.0 }
0x135e   : > { %2059 = vadd.xlane.f32.xlu1 %v2058_v15  ;;  %v2584_v16 = vpop.f32.mrf.mxu0 }
0x136f   : > { %878 = vrot.lane.b32.xlu1 %v3064_v1, %s2758_s3  ;;  %v2657_v1 = vld [vmem:[%s3395_s18 + $0x14] ss:$8 sps:$4 sm:$0xff]  }
0x1370   : > { %2125 = vmatprep.subr.bf16.mxu1 %v2657_v1 }
0x1371   : > { %2126 = vmatpush1.bf16.msra.mxu1 %v2655_v43 }
0x1372   : > { %2127 = vmatprep.subr.bf16.mxu1 %v2660_v25 }
0x1375   : > { %2128 = vmatpush1.bf16.msra.mxu1 %v2658_v26 }
0x13e7   : > { %v2060_v17 = vpop.xlane.xlu1 %2059 }
0x13e8   : > { %v2061_v19 = vmul.f32 0.03125, %v2060_v17 }
0x13ea   : > { %v2062_v20 = vsub.f32 %v2055_v13, %v2061_v19 }
0x13eb   : > { %v879_v21 = vpop.permute.xlu1 %878 }
0x13ec   : > { %882 = vst.msk [vmem:[%s649_s30] sm:$0xff] %vm881_vm11, %v879_v21  ;;  %v2063_v22 = vmul.f32 %v2062_v20, %v2062_v20 }
0x13ee   : > { %v2064_v23 = vsel %vm781_vm2, %v2063_v22, 0.0 }
0x13ef   : > { %2065 = vadd.xlane.f32.xlu0 %v2064_v23 }
0x1405   : > { %1515 = vrot.lane.b32.xlu0 %v3206_v24, %s2762_s19  ;;  %s2157_s19 = scalar_lea.sflag [#allocation3], %s630_s29 }
0x1478   : > { %v2066_v24 = vpop.xlane.xlu0 %2065 }
0x1479   : > { %v2067_v27 = vmul.f32 0.03125, %v2066_v24 }
0x147b   : > { %v2068_v28 = vadd.f32 1e-05, %v2067_v27 }
0x147c   : > { %v1516_v29 = vpop.permute.xlu0 %1515 }
0x147d   : > { %2689 = vrsqrt.f32 %v2068_v28  ;;  %1519 = vst.msk [vmem:[%s649_s30] sm:$0xff] %vm1518_vm12, %v1516_v29  ;;  %s2175_s30 = sshll.u32 %s632_s26, 4  ;;  %s3333_s30 = int_to_ptr.vmem [resolvable:$true] %s2175_s30 }
0x147e   : > { %s2691_s24 = scalar_lea.vmem %s3333_s30, 256  ;;  %p2698_p0 = scmp.lt.s32.totalorder %s3333_s30, %s2696_s27 }
0x147f   : > { %p2692_p11 = scmp.ne.s32.totalorder %s3333_s30, %s2691_s24  ;;  %p2699_p1 = scmp.lt.s32.totalorder %s2697_s5, %s2691_s24 }
0x1481   : > { %p2693_p12 = pnand %p2692_p11, %p2907_p5  ;;  %p2700_p2 = por %p2699_p1, %p2698_p0 }
0x1483   : > { %p2694_p13 = pneg %p2693_p12 }
0x1485   : > { %p2701_p3 = pnand %p2700_p2, %p2694_p13 }
0x148a   : > { %v2690_v30 = vpop.eup %2689 }
0x148b   : > { %v2070_v32 = vmul.f32 %v2690_v30, %v2062_v20 }
0x148d   : > { %v2077_v34 = vmul.f32 %v2363_v31, %v2070_v32 }
0x148f   : > { %v2084_v35 = vadd.f32 %v2364_v33, %v2077_v34 }
0x1491   : > { %v2085_v36 = vpack.c.bf16 %v2084_v35, %v2084_v35 }
0x1493   : > { %2369 = vmatmul.mubr.msk.bf16.vlgmr.msra.gmra.mxu1 %vm781_vm2, %v2085_v36 }
0x1553   : > { %v2147_v37 = vpop.f32.mrf.mxu1 }
0x1554   : > { %2154 = vst [vmem:[%s632_s26] sm:$0xff] %v2147_v37 }
0x1555   : > { %v2149_v38 = vpop.f32.mrf.mxu1 }
0x1556   : > { %2155 = vst [vmem:[%s632_s26 + $0x8] sm:$0xff] %v2149_v38 }
0x1557   : > { %v2151_v39 = vpop.f32.mrf.mxu1 }
0x1558   : > { %2704 = shalt.err (!%p2701_p3)
}
0x1559   : > { %s2705_s26 = scalar_lea.hbm %s3338_s1, 256  ;;  %s2709_s23 = scalar_lea.hbm %s3439_s28, 512 }
0x155a   : > { %p2706_p4 = scmp.ne.s32.totalorder %s3338_s1, %s2705_s26  ;;  %p2710_p9 = scmp.lt.s32.totalorder %s3338_s1, %s3439_s28 }
0x155b   : > { %p2711_p10 = scmp.lt.s32.totalorder %s2709_s23, %s2705_s26 }
0x155c   : > { %p2707_p7 = pnand %p2706_p4, %p2907_p5 }
0x155d   : > { %p2712_p11 = por %p2711_p10, %p2710_p9 }
0x155e   : > { %p2708_p8 = pneg %p2707_p7 }
0x1560   : > { %p2713_p12 = pnand %p2712_p11, %p2708_p8 }
0x1562   : > { %2716 = shalt.err (!%p2713_p12)
}
0x1563   : > { %2585 = dma.vmem_to_hbm [thread:$0]  (%p2907_p5), %s3333_s30, 256, %s3338_s1, %s2157_s19   ;;  %v2152_v40 = vpop.f32.mrf.mxu1 }
0x1564 PF: > { %s3440_s5 = sld [smem:[#allocation7_spill]] }
0x1565   : > { %s3441_s24 = sld [smem:[#allocation5_spill]] }
0x156a   : > { %p2591_p13 = scmp.ge.s32.totalorder %s3440_s5, 2 }
0x156b   : > { %s2190_s29 = sand.u32 1, %s3441_s24  }
0x156c   : > { %p2588_p0 = pnand %p2591_p13, %p2911_p6  ;;  %s2191_s4 = scalar_lea.sflag [#allocation3], %s2190_s29 }
0x156e   : > { %p2589_p1 = pneg %p2588_p0 }
0x1570   : > { %2734 = dma.done.wait (%p2589_p1), %s2191_s4, 256  }
0x1571   : > { %2736 = vsyncadd (%p2589_p1), %s2191_s4, 4294967040  ;;  %s3443_s24 = sld [smem:[#allocation8_spill]]  ;;  %s3446_s1 = smov %s2743_s22 }
0x1572   : > { %s3444_s26 = sld [smem:[#allocation6_spill]] }
0x1573   : > { %s3445_s23 = sld [smem:[#allocation9_spill]] }
0x1577   : > { %p31_p2 = scmp.ge.s32.totalorder %s3443_s24, 4  }
0x1578   : > { %s3447_s22 = smov %s3444_s26 }
0x1579   :  { %33 = sbr.rel (!%p31_p2) target bundleno = 11 (0xb), region = 158 }
0x157e   :  { %2203 = vsyncpa [#allocation3], 1 }
0x157f   :  { %2205 = vsyncpa [#allocation3 + $0x1], 1 }

</bundles_post_ra>
